<compile_context>
chip_gen: v7x
topology: tpu7x:2x2x1
jax: 0.10.0
libtpu: 0.0.40
codegen_flags: <defaults>
</compile_context>

<pallas_src>
import math

import jax
import jax.numpy as jnp
from jax import lax
from jax.experimental import pallas as pl
from jax.experimental.pallas import tpu as pltpu


def _round_up(x, m):
    return (x + m - 1) // m * m


def _layout(vocab_size, emb_dim):
    """Row/column layout of the single packed parameter buffer."""
    V0, V1, V2 = vocab_size
    E = emb_dim
    V0P = _round_up(V0, 8)
    V1P = _round_up(V1, 8)
    V2P = _round_up(V2, 128)                 # lane-aligned [add | delete] split
    W = _round_up(max(E, 8 * E, 2 * V2P), 128)
    offs = {}
    off = 0
    for name, rows in (("emb0", V0P), ("emb1", V1P), ("wh", 2 * E), ("bh", 1),
                       ("w1", E), ("b1", 1), ("w2", 4 * E), ("b2", 1)):
        offs[name] = off
        off = _round_up(off + rows, 8)       # 8-aligned row offsets
    R = _round_up(off, 8)
    return dict(V0=V0, V1=V1, V2=V2, E=E, V0P=V0P, V1P=V1P, V2P=V2P,
                W=W, R=R, offs=offs)


def init_params(key, vocab_size, emb_dim):
    """Deterministic synthetic parameters; all packing hoisted to init time."""
    V0, V1, V2 = vocab_size
    E = emb_dim
    ks = jax.random.split(key, 12)

    def lin(kw, kb, fan_in, fan_out):
        bound = 1.0 / math.sqrt(fan_in)
        w = jax.random.uniform(kw, (fan_in, fan_out), jnp.float32, -bound, bound)
        b = jax.random.uniform(kb, (1, fan_out), jnp.float32, -bound, bound)
        return w, b

    raw = {}
    raw["emb0"] = jax.random.uniform(ks[0], (V0, E), jnp.float32, -0.1, 0.1)
    raw["emb1"] = jax.random.uniform(ks[1], (V1, E), jnp.float32, -0.1, 0.1)
    raw["wh"], raw["bh"] = lin(ks[2], ks[3], 2 * E, E)         # health_net
    raw["w1a"], raw["b1a"] = lin(ks[4], ks[5], E, 4 * E)       # add_net layer 1
    raw["w2a"], raw["b2a"] = lin(ks[6], ks[7], 4 * E, V2)      # add_net layer 2
    raw["w1d"], raw["b1d"] = lin(ks[8], ks[9], E, 4 * E)       # delete_net layer 1
    raw["w2d"], raw["b2d"] = lin(ks[10], ks[11], 4 * E, V2)    # delete_net layer 2

    # ---- one-time packing into a single lane-dense buffer -------------------
    # TODO(synk): store weights in bf16 at realistic sizes (v6e/v7x) to halve DMA.
    L = _layout(vocab_size, emb_dim)
    o = L["offs"]
    buf = jnp.zeros((L["R"], L["W"]), jnp.float32)

    def put(b, name, arr, col=0):
        r = o[name]
        return b.at[r:r + arr.shape[0], col:col + arr.shape[1]].set(arr)

    buf = put(buf, "emb0", raw["emb0"])                               # (V0, E)
    buf = put(buf, "emb1", raw["emb1"])                               # (V1, E)
    buf = put(buf, "wh", raw["wh"])                                   # (2E, E)
    buf = put(buf, "bh", raw["bh"])                                   # (1, E)
    buf = put(buf, "w1", jnp.concatenate([raw["w1a"], raw["w1d"]], 1))  # (E, 8E)
    buf = put(buf, "b1", jnp.concatenate([raw["b1a"], raw["b1d"]], 1))  # (1, 8E)
    buf = put(buf, "w2", raw["w2a"])                                  # cols [0, V2)
    buf = put(buf, "w2", raw["w2d"], col=L["V2P"])                    # cols [V2P, V2P+V2)
    buf = put(buf, "b2", raw["b2a"])
    buf = put(buf, "b2", raw["b2d"], col=L["V2P"])
    return buf, raw


def make_simnn_forward(vocab_size, emb_dim, max_diag, max_prod,
                       batch=8, batch_tile=8):
    """Builds a jitted batched forward closing over static sizes."""
    L = _layout(vocab_size, emb_dim)
    V0, V1, V2, E = L["V0"], L["V1"], L["V2"], L["E"]
    V0P, V1P, V2P, W, R = L["V0P"], L["V1P"], L["V2P"], L["W"], L["R"]
    o = L["offs"]
    Ld, Lp = max_diag, max_prod
    TB = batch_tile
    B_pad = _round_up(max(batch, 1), TB)
    HP = lax.Precision.HIGHEST

    def kernel(didx_ref, pidx_ref, p_ref, out_ref):
        f32 = jnp.float32

        # One-hot occurrence counts over each vocab (VPU only, batch-vectorized).
        # Out-of-range / negative (padding) indices simply match no lane.
        diag_iota = lax.broadcasted_iota(jnp.int32, (TB, V0P), 1)
        dcounts = jnp.zeros((TB, V0P), f32)
        for l in range(Ld):                               # static unroll
            v = didx_ref[:, l:l + 1]                      # (TB, 1) int32
            dcounts += (diag_iota == jnp.where(v >= 0, v, -1)).astype(f32)

        prod_iota = lax.broadcasted_iota(jnp.int32, (TB, V1P), 1)
        pcounts = jnp.zeros((TB, V1P), f32)
        for l in range(Lp):                               # static unroll
            v = pidx_ref[:, l:l + 1]
            pcounts += (prod_iota == jnp.where(v >= 0, v, -1)).astype(f32)

        # Static (zero-cost) views into the single packed parameter buffer.
        emb0 = p_ref[o["emb0"]:o["emb0"] + V0P, :E]
        emb1 = p_ref[o["emb1"]:o["emb1"] + V1P, :E]
        wh   = p_ref[o["wh"]:o["wh"] + 2 * E, :E]
        bh   = p_ref[o["bh"]:o["bh"] + 1, :E]
        w1   = p_ref[o["w1"]:o["w1"] + E, :8 * E]
        b1   = p_ref[o["b1"]:o["b1"] + 1, :8 * E]
        w2a  = p_ref[o["w2"]:o["w2"] + 4 * E, 0:V2P]
        w2d  = p_ref[o["w2"]:o["w2"] + 4 * E, V2P:2 * V2P]
        b2a  = p_ref[o["b2"]:o["b2"] + 1, 0:V2P]
        b2d  = p_ref[o["b2"]:o["b2"] + 1, V2P:2 * V2P]

        # counts @ embedding rows == sum of selected embedding rows.
        diag_sum = jnp.dot(dcounts, emb0, precision=HP, preferred_element_type=f32)
        prod_sum = jnp.dot(pcounts, emb1, precision=HP, preferred_element_type=f32)
        hr = jnp.concatenate([diag_sum, prod_sum], axis=1)            # (TB, 2E)

        # health_net: Linear(2E -> E)
        rep = jnp.dot(hr, wh, precision=HP, preferred_element_type=f32) + bh

        # add_net & delete_net first layers fused on the lane axis: (TB, 8E)
        h = jnp.dot(rep, w1, precision=HP, preferred_element_type=f32) + b1
        h = jnp.maximum(h, 0.0)                                       # ReLU

        # Second layers: two dense matmuls, lane-aligned splits (4E and V2P).
        o_add = jnp.dot(h[:, :4 * E], w2a, precision=HP,
                        preferred_element_type=f32) + b2a             # (TB, V2P)
        o_del = jnp.dot(h[:, 4 * E:], w2d, precision=HP,
                        preferred_element_type=f32) + b2d             # (TB, V2P)

        # torch forward quirk: "remain" reuses delete_net's output.
        # Single lane-dense store: [remain | add | delete].
        out_ref[...] = jnp.concatenate([o_del, o_add, o_del], axis=1)

    grid_spec = pltpu.PrefetchScalarGridSpec(
        num_scalar_prefetch=0,
        grid=(B_pad // TB,),
        in_specs=[
            pl.BlockSpec((TB, Ld), lambda g: (g, 0)),        # diag indices
            pl.BlockSpec((TB, Lp), lambda g: (g, 0)),        # prod indices
            pl.BlockSpec((R, W), lambda g: (0, 0)),          # packed params (one DMA)
        ],
        out_specs=pl.BlockSpec((TB, 3 * V2P), lambda g: (g, 0)),
    )

    call = pl.pallas_call(
        kernel,
        grid_spec=grid_spec,
        out_shape=jax.ShapeDtypeStruct((B_pad, 3 * V2P), jnp.float32),
        compiler_params=pltpu.CompilerParams(
            dimension_semantics=("parallel",)),              # v7x megacore over batch
    )

    def _prep(idx, Lmax):
        nb, l = idx.shape
        if l > Lmax:
            raise ValueError(f"too many codes per visit: {l} > {Lmax}")
        if nb > B_pad:
            raise ValueError(f"batch {nb} > kernel batch {B_pad}")
        idx = jnp.pad(idx, ((0, 0), (0, Lmax - l)), constant_values=-1)
        # torch quirk: an empty code list falls back to code 0.
        empty = jnp.all(idx < 0, axis=1, keepdims=True)
        idx = jnp.where(empty & (jnp.arange(Lmax)[None, :] == 0), 0, idx)
        return jnp.pad(idx, ((0, B_pad - nb), (0, 0)), constant_values=-1)

    def forward(params_buf, diag_idx, prod_idx):
        diag_idx = jnp.asarray(diag_idx, jnp.int32)
        prod_idx = jnp.asarray(prod_idx, jnp.int32)
        squeeze = diag_idx.ndim == 1
        if squeeze:
            diag_idx = diag_idx[None, :]
        if prod_idx.ndim == 1:
            prod_idx = prod_idx[None, :]
        nb = diag_idx.shape[0]
        if prod_idx.shape[0] != nb:
            raise ValueError("diag/prod batch size mismatch")

        raw_out = call(_prep(diag_idx, Ld), _prep(prod_idx, Lp), params_buf)
        out = raw_out[:nb].reshape(nb, 3, V2P)[:, :, :V2]    # drop lane padding
        out = jnp.transpose(out, (0, 2, 1))                  # (nb, V2, 3)
        return out[0] if squeeze else out                    # (V2, 3) per visit

    return jax.jit(forward)


def simnn_reference(raw, diag_codes, prod_codes):
    """Pure-JAX reference of the torch forward (eval mode), single visit."""
    HP = lax.Precision.HIGHEST
    d = jnp.take(raw["emb0"], diag_codes, axis=0).sum(0, keepdims=True)
    p = jnp.take(raw["emb1"], prod_codes, axis=0).sum(0, keepdims=True)
    hr = jnp.concatenate([d, p], axis=1)
    rep = jnp.dot(hr, raw["wh"], precision=HP) + raw["bh"]

    def mlp(w1, b1, w2, b2):
        h = jnp.maximum(jnp.dot(rep, w1, precision=HP) + b1, 0.0)
        return jnp.dot(h, w2, precision=HP) + b2

    add = mlp(raw["w1a"], raw["b1a"], raw["w2a"], raw["b2a"])
    dele = mlp(raw["w1d"], raw["b1d"], raw["w2d"], raw["b2d"])
    return jnp.concatenate([dele, add, dele], axis=0).T      # (V2, 3)


if __name__ == "__main__":
    vocab_size = (10, 12, 16)       # (diag vocab, proc vocab, med vocab)
    emb_dim = 32
    B, MAX_D, MAX_P = 8, 5, 3

    key = jax.random.PRNGKey(0)
    packed, raw = init_params(key, vocab_size, emb_dim)

    kd, kp = jax.random.split(jax.random.PRNGKey(0), 2)
    diag_idx = jax.random.randint(kd, (B, MAX_D), 0, vocab_size[0], dtype=jnp.int32)
    prod_idx = jax.random.randint(kp, (B, MAX_P), 0, vocab_size[1], dtype=jnp.int32)
    # Ragged visits: mark some trailing code slots as padding (-1).
    diag_idx = diag_idx.at[0, 4].set(-1).at[3, 3:].set(-1)
    prod_idx = prod_idx.at[1, 2].set(-1).at[5, 1:].set(-1)

    forward = make_simnn_forward(vocab_size, emb_dim,
                                 max_diag=MAX_D, max_prod=MAX_P, batch=B)

    out = jax.block_until_ready(forward(packed, diag_idx, prod_idx))  # (B, V2, 3)
    assert out.shape == (B, vocab_size[2], 3), out.shape
    assert bool(jnp.all(jnp.isfinite(out)))
    # remain (col 0) and delete (col 2) come from the same net -> identical.
    assert bool(jnp.allclose(out[:, :, 0], out[:, :, 2]))

    # Per-visit numerics vs. a pure-JAX reference of the torch forward.
    for b in range(B):
        d = diag_idx[b]; d = d[d >= 0]
        p = prod_idx[b]; p = p[p >= 0]
        ref = simnn_reference(raw, d, p)
        err = float(jnp.max(jnp.abs(out[b] - ref)))
        assert bool(jnp.allclose(out[b], ref, rtol=2e-2, atol=2e-2)), (b, err)

    # Single-visit (torch-module-shaped) path: 1-D code lists -> (V2, 3).
    out1 = jax.block_until_ready(forward(packed, diag_idx[0], prod_idx[0]))
    assert out1.shape == (vocab_size[2], 3), out1.shape
    assert bool(jnp.allclose(out1, out[0], rtol=1e-5, atol=1e-5))

    print("KERNEL_OK")
</pallas_src>

<mosaic_0001>
module attributes {stable_mosaic.version = 11 : i64} {
  func.func @kernel(%arg0: i32, %arg1: memref<8x5xi32, #tpu.memory_space<vmem>>, %arg2: memref<8x3xi32, #tpu.memory_space<vmem>>, %arg3: memref<280x256xf32, #tpu.memory_space<vmem>>, %arg4: memref<8x384xf32, #tpu.memory_space<vmem>>) attributes {dimension_semantics = [#tpu.dimension_semantics<parallel>], iteration_bounds = array<i64: 1>, scalar_prefetch = 0 : i64, scratch_operands = 0 : i64, tpu.core_type = #tpu.core_type<tc>, window_params = [{transform_indices = @transform_0, window_bounds = array<i64: 8, 5>}, {transform_indices = @transform_1, window_bounds = array<i64: 8, 3>}, {pipeline_mode = #tpu.pipeline_mode<synchronous>, transform_indices = @transform_2, window_bounds = array<i64: 280, 256>}, {transform_indices = @transform_3, window_bounds = array<i64: 8, 384>}]} {
    %0 = tpu.iota {dimensions = array<i32: 1>} : vector<8x16xi32>
    %cst = arith.constant 0.000000e+00 : f32
    %1 = vector.broadcast %cst : f32 to vector<8x16xf32>
    %c0 = arith.constant 0 : index
    %c0_0 = arith.constant 0 : index
    %2 = vector.load %arg1[%c0, %c0_0] : memref<8x5xi32, #tpu.memory_space<vmem>>, vector<8x1xi32>
    %c0_i32 = arith.constant 0 : i32
    %3 = vector.broadcast %c0_i32 : i32 to vector<8x1xi32>
    %4 = arith.cmpi sge, %2, %3 : vector<8x1xi32>
    %c-1_i32 = arith.constant -1 : i32
    %5 = vector.broadcast %c-1_i32 : i32 to vector<8x1xi32>
    %6 = arith.select %4, %2, %5 : vector<8x1xi1>, vector<8x1xi32>
    %7 = vector.broadcast %6 : vector<8x1xi32> to vector<8x16xi32>
    %8 = arith.cmpi eq, %0, %7 : vector<8x16xi32>
    %9 = arith.extui %8 : vector<8x16xi1> to vector<8x16xi32>
    %10 = arith.sitofp %9 : vector<8x16xi32> to vector<8x16xf32>
    %11 = arith.addf %1, %10 : vector<8x16xf32>
    %c0_1 = arith.constant 0 : index
    %c1 = arith.constant 1 : index
    %12 = vector.load %arg1[%c0_1, %c1] : memref<8x5xi32, #tpu.memory_space<vmem>>, vector<8x1xi32>
    %c0_i32_2 = arith.constant 0 : i32
    %13 = vector.broadcast %c0_i32_2 : i32 to vector<8x1xi32>
    %14 = arith.cmpi sge, %12, %13 : vector<8x1xi32>
    %c-1_i32_3 = arith.constant -1 : i32
    %15 = vector.broadcast %c-1_i32_3 : i32 to vector<8x1xi32>
    %16 = arith.select %14, %12, %15 : vector<8x1xi1>, vector<8x1xi32>
    %17 = vector.broadcast %16 : vector<8x1xi32> to vector<8x16xi32>
    %18 = arith.cmpi eq, %0, %17 : vector<8x16xi32>
    %19 = arith.extui %18 : vector<8x16xi1> to vector<8x16xi32>
    %20 = arith.sitofp %19 : vector<8x16xi32> to vector<8x16xf32>
    %21 = arith.addf %11, %20 : vector<8x16xf32>
    %c0_4 = arith.constant 0 : index
    %c2 = arith.constant 2 : index
    %22 = vector.load %arg1[%c0_4, %c2] : memref<8x5xi32, #tpu.memory_space<vmem>>, vector<8x1xi32>
    %c0_i32_5 = arith.constant 0 : i32
    %23 = vector.broadcast %c0_i32_5 : i32 to vector<8x1xi32>
    %24 = arith.cmpi sge, %22, %23 : vector<8x1xi32>
    %c-1_i32_6 = arith.constant -1 : i32
    %25 = vector.broadcast %c-1_i32_6 : i32 to vector<8x1xi32>
    %26 = arith.select %24, %22, %25 : vector<8x1xi1>, vector<8x1xi32>
    %27 = vector.broadcast %26 : vector<8x1xi32> to vector<8x16xi32>
    %28 = arith.cmpi eq, %0, %27 : vector<8x16xi32>
    %29 = arith.extui %28 : vector<8x16xi1> to vector<8x16xi32>
    %30 = arith.sitofp %29 : vector<8x16xi32> to vector<8x16xf32>
    %31 = arith.addf %21, %30 : vector<8x16xf32>
    %c0_7 = arith.constant 0 : index
    %c3 = arith.constant 3 : index
    %32 = vector.load %arg1[%c0_7, %c3] : memref<8x5xi32, #tpu.memory_space<vmem>>, vector<8x1xi32>
    %c0_i32_8 = arith.constant 0 : i32
    %33 = vector.broadcast %c0_i32_8 : i32 to vector<8x1xi32>
    %34 = arith.cmpi sge, %32, %33 : vector<8x1xi32>
    %c-1_i32_9 = arith.constant -1 : i32
    %35 = vector.broadcast %c-1_i32_9 : i32 to vector<8x1xi32>
    %36 = arith.select %34, %32, %35 : vector<8x1xi1>, vector<8x1xi32>
    %37 = vector.broadcast %36 : vector<8x1xi32> to vector<8x16xi32>
    %38 = arith.cmpi eq, %0, %37 : vector<8x16xi32>
    %39 = arith.extui %38 : vector<8x16xi1> to vector<8x16xi32>
    %40 = arith.sitofp %39 : vector<8x16xi32> to vector<8x16xf32>
    %41 = arith.addf %31, %40 : vector<8x16xf32>
    %c0_10 = arith.constant 0 : index
    %c4 = arith.constant 4 : index
    %42 = vector.load %arg1[%c0_10, %c4] : memref<8x5xi32, #tpu.memory_space<vmem>>, vector<8x1xi32>
    %c0_i32_11 = arith.constant 0 : i32
    %43 = vector.broadcast %c0_i32_11 : i32 to vector<8x1xi32>
    %44 = arith.cmpi sge, %42, %43 : vector<8x1xi32>
    %c-1_i32_12 = arith.constant -1 : i32
    %45 = vector.broadcast %c-1_i32_12 : i32 to vector<8x1xi32>
    %46 = arith.select %44, %42, %45 : vector<8x1xi1>, vector<8x1xi32>
    %47 = vector.broadcast %46 : vector<8x1xi32> to vector<8x16xi32>
    %48 = arith.cmpi eq, %0, %47 : vector<8x16xi32>
    %49 = arith.extui %48 : vector<8x16xi1> to vector<8x16xi32>
    %50 = arith.sitofp %49 : vector<8x16xi32> to vector<8x16xf32>
    %51 = arith.addf %41, %50 : vector<8x16xf32>
    %52 = tpu.iota {dimensions = array<i32: 1>} : vector<8x16xi32>
    %cst_13 = arith.constant 0.000000e+00 : f32
    %53 = vector.broadcast %cst_13 : f32 to vector<8x16xf32>
    %c0_14 = arith.constant 0 : index
    %c0_15 = arith.constant 0 : index
    %54 = vector.load %arg2[%c0_14, %c0_15] : memref<8x3xi32, #tpu.memory_space<vmem>>, vector<8x1xi32>
    %c0_i32_16 = arith.constant 0 : i32
    %55 = vector.broadcast %c0_i32_16 : i32 to vector<8x1xi32>
    %56 = arith.cmpi sge, %54, %55 : vector<8x1xi32>
    %c-1_i32_17 = arith.constant -1 : i32
    %57 = vector.broadcast %c-1_i32_17 : i32 to vector<8x1xi32>
    %58 = arith.select %56, %54, %57 : vector<8x1xi1>, vector<8x1xi32>
    %59 = vector.broadcast %58 : vector<8x1xi32> to vector<8x16xi32>
    %60 = arith.cmpi eq, %52, %59 : vector<8x16xi32>
    %61 = arith.extui %60 : vector<8x16xi1> to vector<8x16xi32>
    %62 = arith.sitofp %61 : vector<8x16xi32> to vector<8x16xf32>
    %63 = arith.addf %53, %62 : vector<8x16xf32>
    %c0_18 = arith.constant 0 : index
    %c1_19 = arith.constant 1 : index
    %64 = vector.load %arg2[%c0_18, %c1_19] : memref<8x3xi32, #tpu.memory_space<vmem>>, vector<8x1xi32>
    %c0_i32_20 = arith.constant 0 : i32
    %65 = vector.broadcast %c0_i32_20 : i32 to vector<8x1xi32>
    %66 = arith.cmpi sge, %64, %65 : vector<8x1xi32>
    %c-1_i32_21 = arith.constant -1 : i32
    %67 = vector.broadcast %c-1_i32_21 : i32 to vector<8x1xi32>
    %68 = arith.select %66, %64, %67 : vector<8x1xi1>, vector<8x1xi32>
    %69 = vector.broadcast %68 : vector<8x1xi32> to vector<8x16xi32>
    %70 = arith.cmpi eq, %52, %69 : vector<8x16xi32>
    %71 = arith.extui %70 : vector<8x16xi1> to vector<8x16xi32>
    %72 = arith.sitofp %71 : vector<8x16xi32> to vector<8x16xf32>
    %73 = arith.addf %63, %72 : vector<8x16xf32>
    %c0_22 = arith.constant 0 : index
    %c2_23 = arith.constant 2 : index
    %74 = vector.load %arg2[%c0_22, %c2_23] : memref<8x3xi32, #tpu.memory_space<vmem>>, vector<8x1xi32>
    %c0_i32_24 = arith.constant 0 : i32
    %75 = vector.broadcast %c0_i32_24 : i32 to vector<8x1xi32>
    %76 = arith.cmpi sge, %74, %75 : vector<8x1xi32>
    %c-1_i32_25 = arith.constant -1 : i32
    %77 = vector.broadcast %c-1_i32_25 : i32 to vector<8x1xi32>
    %78 = arith.select %76, %74, %77 : vector<8x1xi1>, vector<8x1xi32>
    %79 = vector.broadcast %78 : vector<8x1xi32> to vector<8x16xi32>
    %80 = arith.cmpi eq, %52, %79 : vector<8x16xi32>
    %81 = arith.extui %80 : vector<8x16xi1> to vector<8x16xi32>
    %82 = arith.sitofp %81 : vector<8x16xi32> to vector<8x16xf32>
    %83 = arith.addf %73, %82 : vector<8x16xf32>
    %c0_26 = arith.constant 0 : index
    %c0_27 = arith.constant 0 : index
    %84 = vector.load %arg3[%c0_26, %c0_27] : memref<280x256xf32, #tpu.memory_space<vmem>>, vector<16x32xf32>
    %c16 = arith.constant 16 : index
    %c0_28 = arith.constant 0 : index
    %85 = vector.load %arg3[%c16, %c0_28] : memref<280x256xf32, #tpu.memory_space<vmem>>, vector<16x32xf32>
    %c32 = arith.constant 32 : index
    %c0_29 = arith.constant 0 : index
    %86 = vector.load %arg3[%c32, %c0_29] : memref<280x256xf32, #tpu.memory_space<vmem>>, vector<64x32xf32>
    %c96 = arith.constant 96 : index
    %c0_30 = arith.constant 0 : index
    %87 = vector.load %arg3[%c96, %c0_30] : memref<280x256xf32, #tpu.memory_space<vmem>>, vector<1x32xf32>
    %c104 = arith.constant 104 : index
    %c0_31 = arith.constant 0 : index
    %88 = vector.load %arg3[%c104, %c0_31] : memref<280x256xf32, #tpu.memory_space<vmem>>, vector<32x256xf32>
    %c136 = arith.constant 136 : index
    %c0_32 = arith.constant 0 : index
    %89 = vector.load %arg3[%c136, %c0_32] : memref<280x256xf32, #tpu.memory_space<vmem>>, vector<1x256xf32>
    %c144 = arith.constant 144 : index
    %c0_33 = arith.constant 0 : index
    %90 = vector.load %arg3[%c144, %c0_33] : memref<280x256xf32, #tpu.memory_space<vmem>>, vector<128x128xf32>
    %c144_34 = arith.constant 144 : index
    %c128 = arith.constant 128 : index
    %91 = vector.load %arg3[%c144_34, %c128] : memref<280x256xf32, #tpu.memory_space<vmem>>, vector<128x128xf32>
    %c272 = arith.constant 272 : index
    %c0_35 = arith.constant 0 : index
    %92 = vector.load %arg3[%c272, %c0_35] : memref<280x256xf32, #tpu.memory_space<vmem>>, vector<1x128xf32>
    %c272_36 = arith.constant 272 : index
    %c128_37 = arith.constant 128 : index
    %93 = vector.load %arg3[%c272_36, %c128_37] : memref<280x256xf32, #tpu.memory_space<vmem>>, vector<1x128xf32>
    %cst_38 = arith.constant dense<0.000000e+00> : vector<8x32xf32>
    %94 = tpu.matmul %51, %84, %cst_38 {dimension_numbers = #tpu.dot_dimension_numbers<[1], [0], [0], [1], [0, 0, 1, 1], [], []>, precision = #tpu.contract_precision<fp32>} : vector<8x16xf32>, vector<16x32xf32>, vector<8x32xf32> -> vector<8x32xf32>
    %cst_39 = arith.constant dense<0.000000e+00> : vector<8x32xf32>
    %95 = tpu.matmul %83, %85, %cst_39 {dimension_numbers = #tpu.dot_dimension_numbers<[1], [0], [0], [1], [0, 0, 1, 1], [], []>, precision = #tpu.contract_precision<fp32>} : vector<8x16xf32>, vector<16x32xf32>, vector<8x32xf32> -> vector<8x32xf32>
    %96 = tpu.concatenate %94, %95 in 1 : vector<8x32xf32>, vector<8x32xf32> -> vector<8x64xf32>
    %cst_40 = arith.constant dense<0.000000e+00> : vector<8x32xf32>
    %97 = tpu.matmul %96, %86, %cst_40 {dimension_numbers = #tpu.dot_dimension_numbers<[1], [0], [0], [1], [0, 0, 1, 1], [], []>, precision = #tpu.contract_precision<fp32>} : vector<8x64xf32>, vector<64x32xf32>, vector<8x32xf32> -> vector<8x32xf32>
    %98 = vector.broadcast %87 : vector<1x32xf32> to vector<8x32xf32>
    %99 = arith.addf %97, %98 : vector<8x32xf32>
    %cst_41 = arith.constant dense<0.000000e+00> : vector<8x256xf32>
    %100 = tpu.matmul %99, %88, %cst_41 {dimension_numbers = #tpu.dot_dimension_numbers<[1], [0], [0], [1], [0, 0, 1, 1], [], []>, precision = #tpu.contract_precision<fp32>} : vector<8x32xf32>, vector<32x256xf32>, vector<8x256xf32> -> vector<8x256xf32>
    %101 = vector.broadcast %89 : vector<1x256xf32> to vector<8x256xf32>
    %102 = arith.addf %100, %101 : vector<8x256xf32>
    %cst_42 = arith.constant 0.000000e+00 : f32
    %103 = vector.broadcast %cst_42 : f32 to vector<8x256xf32>
    %104 = arith.maximumf %102, %103 : vector<8x256xf32>
    %105 = vector.extract_strided_slice %104 {offsets = [0, 0], sizes = [8, 128], strides = [1, 1]} : vector<8x256xf32> to vector<8x128xf32>
    %cst_43 = arith.constant dense<0.000000e+00> : vector<8x128xf32>
    %106 = tpu.matmul %105, %90, %cst_43 {dimension_numbers = #tpu.dot_dimension_numbers<[1], [0], [0], [1], [0, 0, 1, 1], [], []>, precision = #tpu.contract_precision<fp32>} : vector<8x128xf32>, vector<128x128xf32>, vector<8x128xf32> -> vector<8x128xf32>
    %107 = vector.broadcast %92 : vector<1x128xf32> to vector<8x128xf32>
    %108 = arith.addf %106, %107 : vector<8x128xf32>
    %109 = vector.extract_strided_slice %104 {offsets = [0, 128], sizes = [8, 128], strides = [1, 1]} : vector<8x256xf32> to vector<8x128xf32>
    %cst_44 = arith.constant dense<0.000000e+00> : vector<8x128xf32>
    %110 = tpu.matmul %109, %91, %cst_44 {dimension_numbers = #tpu.dot_dimension_numbers<[1], [0], [0], [1], [0, 0, 1, 1], [], []>, precision = #tpu.contract_precision<fp32>} : vector<8x128xf32>, vector<128x128xf32>, vector<8x128xf32> -> vector<8x128xf32>
    %111 = vector.broadcast %93 : vector<1x128xf32> to vector<8x128xf32>
    %112 = arith.addf %110, %111 : vector<8x128xf32>
    %113 = tpu.concatenate %112, %108, %112 in 1 : vector<8x128xf32>, vector<8x128xf32>, vector<8x128xf32> -> vector<8x384xf32>
    %c0_45 = arith.constant 0 : index
    %c0_46 = arith.constant 0 : index
    %114 = vector.load %arg4[%c0_45, %c0_46] : memref<8x384xf32, #tpu.memory_space<vmem>>, vector<8x384xf32>
    tpu.vector_store %arg4[%c0_45, %c0_46], %113 {strides = array<i32>} : memref<8x384xf32, #tpu.memory_space<vmem>>, vector<8x384xf32>,
    return
  }
  func.func @transform_0(%arg0: i32) -> (i32, i32) {
    %c0_i32 = arith.constant 0 : i32
    %c0_i32_0 = arith.constant 0 : i32
    return %arg0, %c0_i32 : i32, i32
  }
  func.func @transform_1(%arg0: i32) -> (i32, i32) {
    %c0_i32 = arith.constant 0 : i32
    %c0_i32_0 = arith.constant 0 : i32
    return %arg0, %c0_i32 : i32, i32
  }
  func.func @transform_2(%arg0: i32) -> (i32, i32) {
    %c0_i32 = arith.constant 0 : i32
    %c0_i32_0 = arith.constant 0 : i32
    %c0_i32_1 = arith.constant 0 : i32
    return %c0_i32, %c0_i32_0 : i32, i32
  }
  func.func @transform_3(%arg0: i32) -> (i32, i32) {
    %c0_i32 = arith.constant 0 : i32
    %c0_i32_0 = arith.constant 0 : i32
    return %arg0, %c0_i32 : i32, i32
  }
}

</mosaic_0001>

<bundles_post_ra>
// kernel: forward.1
= control target key start
LH: loop header
LB: loop body
LE: loop exit
PB: predicated region body
PF: predicated region fallthrough
CT: control target
= control target key end

     0   :  { %8 = vsyncpa [#allocation3], 0  ;;  %s4942_s12 = smov [#allocation2]   ;;  %s5971_s0 = inlined_call_operand.vmem [shape: s32[8,5], index: 0, kind: input, shape index: {}]   ;;  %s5972_s1 = inlined_call_operand.vmem [shape: s32[8,3], index: 1, kind: input, shape index: {}]   ;;  %s5973_s2 = inlined_call_operand.hbm [shape: f32[280,256], index: 2, kind: input, shape index: {}]   ;;  %s5974_s3 = inlined_call_operand.vmem [shape: f32[8,384], index: 3, kind: output, shape index: {}]  }
   0x1   :  { %s18_s13 = sshll.u32 %s4942_s12, 4  ;;  %s4918_s16 = scalar_lea.hbm %s5973_s2, 8960  ;;  %s19_s13 = int_to_ptr.vmem [resolvable:$true] %s18_s13 }
   0x2   :  { %p4919_p0 = scmp.ne.s32.totalorder %s5973_s2, %s4918_s16  ;;  %p4922_p1 = scmp.lt.u32.totalorder %s4918_s16, %s5973_s2 }
   0x4   :  { %p4924_p2 = pnand %p4922_p1, %p4919_p0 }
   0x6   :  { %4927 = shalt.err (!%p4924_p2)
}
   0x7   :  { %s4928_s21 = scalar_lea.vmem %s19_s13, 8960  ;;  %p4933_p4 = scmp.lt.s32.totalorder %s19_s13, %s19_s13 }
   0x8   :  { %p4929_p3 = scmp.ne.s32.totalorder %s19_s13, %s4928_s21  ;;  %p4934_p5 = scmp.lt.s32.totalorder %s4928_s21, %s4928_s21 }
   0xa   :  { %p4935_p6 = por %p4934_p5, %p4933_p4 }
   0xc   :  { %p4936_p7 = pnand %p4935_p6, %p4929_p3 }
   0xe   :  { %4939 = shalt.err (!%p4936_p7)
}
   0xf   :  { %s4943_s22 = smov 256   ;;  %s4944_s23 = smov 16  }
  0x10   :  { %24 = dma.hbm_to_vmem [thread:$0]  %s5973_s2, 8960, %s19_s13, [#allocation3], %s4943_s22, %s4943_s22, %s4944_s23  }
  0x11   :  { %4940 = dma.done.wait [#allocation3], 8960  }
  0x12   :  { %4941 = vsyncadd [#allocation3], 4294958336  ;;  %v4945_v0 = vmov 2   ;;  %v4946_v1 = vmov 0   ;;  %v30_v2 = vld [vmem:[%s5971_s0] sm:$0xff]  ;;  %v4947_v5 = vmov 3   ;;  %v5975_v27 = vlaneseq }
  0x13   :  { %4911 = vset.pattern.permute.xlu1 %v4945_v0  ;;  %4909 = vset.pattern.permute.xlu0 %v4946_v1  ;;  %vm31_vm0 = vcmp.ge.s32.totalorder %v30_v2, 0  ;;  %v68_v4 = vld [vmem:[%s5972_s1] sm:$0xff]  ;;  %v4948_v6 = vmov 1   ;;  %v4949_v7 = vmov 4   ;;  %v93_v10 = vld [vmem:[#allocation2 + $0x10] sm:$0xff]  ;;  %v6004_v16 = vmov 0.0|0.0  }
  0x14   :  { %v32_v3 = vsel %vm31_vm0, %v30_v2, 4294967295  ;;  %vm69_vm1 = vcmp.ge.s32.totalorder %v68_v4, 0  ;;  %v92_v9 = vld [vmem:[#allocation2] sm:$0xff]  ;;  %v157_v12 = vand.u32 4294901760, %v93_v10  ;;  %4396 = vmatprep.subr.bf16.mxu0 %v6004_v16  ;;  %4390 = vmatprep.subr.bf16.mxu1 %v6004_v16  ;;  %vm4951_vm2 = vmmov 0   ;;  %v95_v44 = vld [vmem:[#allocation2 + $0x30] sm:$0xff] }
  0x15   :  { %48 = vperm.xlu1 %4911, %v32_v3   ;;  %34 = vperm.xlu0 %4909, %v32_v3   ;;  %v70_v8 = vsel %vm69_vm1, %v68_v4, 4294967295  ;;  %v154_v11 = vand.u32 4294901760, %v92_v9  ;;  %v5985_v17 = vmov 0.0   ;;  %v29_v28 = vand.u32 127, %v5975_v27  ;;  %v94_v43 = vld [vmem:[#allocation2 + $0x20] sm:$0xff]  ;;  %s4953_s0 = smov 32  }
  0x16   :  { %v239_v14 = vsub.f32 %v93_v10, %v157_v12  ;;  %3790 = vmatprep.mubr.msk.f32.mxu0 %vm4951_vm2, %v5985_v17  ;;  %3776 = vmatprep.mubr.msk.f32.mxu1 %vm4951_vm2, %v5985_v17  ;;  %vm149_vm8 = vcmask 130048   ;;  %v616_v47 = vand.u32 4294901760, %v94_v43  ;;  %v619_v50 = vand.u32 4294901760, %v95_v44  ;;  %v138_v27 = vld [vmem:[#allocation2 + $0x198] sm:$0xff] }
  0x17   :  { %v232_v13 = vsub.f32 %v92_v9, %v154_v11  ;;  %v4999_v20 = vpack.c.bf16 %v157_v12, %v154_v11  ;;  %vm1078_vm12 = vcmask 261120   ;;  %vm1080_vm13 = vcmask 523264  }
  0x18   :  { %v240_v19 = vand.u32 4294901760, %v239_v14  ;;  %v694_v56 = vsub.f32 %v94_v43, %v616_v47  ;;  %v701_v57 = vsub.f32 %v95_v44, %v619_v50 }
  0x19   :  { %4912 = vset.pattern.permute.xlu1 %v4947_v5  ;;  %4910 = vset.pattern.permute.xlu0 %v4948_v6  ;;  %v4397_v15 = vpack.c.bf16 %v239_v14, %v232_v13  ;;  %v233_v18 = vand.u32 4294901760, %v232_v13 }
  0x1a   :  { %55 = vperm.xlu1 %4912, %v32_v3   ;;  %41 = vperm.xlu0 %4910, %v32_v3   ;;  %v241_v22 = vsub.f32 %v239_v14, %v240_v19  ;;  %v695_v62 = vand.u32 4294901760, %v694_v56  ;;  %v702_v63 = vand.u32 4294901760, %v701_v57 }
  0x1b   :  { %4398 = vmatpush3.bf16.msra.mxu0 %v4397_v15  ;;  %4392 = vmatpush3.bf16.msra.mxu1 %v4999_v20  ;;  %v234_v21 = vsub.f32 %v232_v13, %v233_v18  ;;  %v4403_v25 = vpack.c.bf16 %v240_v19, %v233_v18  ;;  %v4415_v13 = vpack.c.bf16 %v701_v57, %v694_v56  ;;  %v96_v15 = vld [vmem:[#allocation2 + $0x40] sm:$0xff]  ;;  %v97_v18 = vld [vmem:[#allocation2 + $0x50] sm:$0xff] }
  0x1c   :  { %4399 = vmatprep.subr.bf16.mxu0 %v6004_v16  ;;  %4393 = vmatprep.subr.bf16.mxu1 %v6004_v16  ;;  %v242_v24 = vand.u32 4294901760, %v241_v22  ;;  %v696_v4 = vsub.f32 %v694_v56, %v695_v62  ;;  %v703_v5 = vsub.f32 %v701_v57, %v702_v63  ;;  %v4421_v14 = vpack.c.bf16 %v702_v63, %v695_v62  ;;  %v5050_v19 = vld [vmem:[#allocation2 + $0x60] sm:$0xff]  ;;  %v99_v22 = vld [vmem:[#allocation2 + $0x70] sm:$0xff] }
  0x1d   :  { %v235_v23 = vand.u32 4294901760, %v234_v21  ;;  %v1088_v21 = vand.u32 4294901760, %v97_v18  ;;  %v102_v63 = vld [vmem:[#allocation2 + $0xa0] sm:$0xff] }
  0x1e   :  { %4913 = vset.pattern.permute.xlu1 %v4949_v7  ;;  %4914 = vset.pattern.permute.xlu0 %v4946_v1  ;;  %v4409_v7 = vpack.c.bf16 %v619_v50, %v616_v47  ;;  %v704_v9 = vand.u32 4294901760, %v703_v5 }
  0x1f   :  { %62 = vperm.xlu1 %4913, %v32_v3   ;;  %72 = vperm.xlu0 %4914, %v70_v8   ;;  %v4394_v26 = vpack.c.bf16 %v242_v24, %v235_v23  ;;  %v1091_v23 = vand.u32 4294901760, %v5050_v19  ;;  %v5053_v24 = vld [vmem:[#allocation2 + $0x80] sm:$0xff] }
  0x23   :  { %4915 = vset.pattern.permute.xlu1 %v4948_v6  ;;  %4917 = vset.pattern.permute.xlu0 %v4945_v0 }
  0x24   :  { %79 = vperm.xlu1 %4915, %v70_v8  }
  0x28   :  { %4916 = vset.pattern.permute.xlu1 %v4945_v0 }
  0x29   :  { %86 = vperm.xlu1 %4916, %v70_v8   ;;  %v697_v8 = vand.u32 4294901760, %v696_v4 }
  0x2b   :  { %v4412_v11 = vpack.c.bf16 %v704_v9, %v697_v8 }
  0x94   :  { %v35_v29 = vpop.permute.xlu0 %34  ;;  %v49_v30 = vpop.permute.xlu1 %48 }
  0x95   :  { %vm36_vm3 = vcmp.eq.s32.totalorder %v29_v28, %v35_v29  ;;  %vm50_vm4 = vcmp.eq.s32.totalorder %v29_v28, %v49_v30 }
  0x96   :  { %v3470_v33 = vsel %vm36_vm3, 1.0, %v5985_v17  ;;  %v3472_v36 = vsel %vm50_vm4, 1.0, %v5985_v17 }
  0x99   :  { %v42_v31 = vpop.permute.xlu0 %41  ;;  %v56_v32 = vpop.permute.xlu1 %55 }
  0x9a   :  { %vm43_vm5 = vcmp.eq.s32.totalorder %v29_v28, %v42_v31  ;;  %vm57_vm6 = vcmp.eq.s32.totalorder %v29_v28, %v56_v32  ;;  %v5061_v31 = vsub.f32 %v97_v18, %v1088_v21  ;;  %v5064_v32 = vsub.f32 %v5050_v19, %v1091_v23 }
  0x9b   :  { %v3471_v34 = vsel %vm43_vm5, 1.0, %v5985_v17  ;;  %v3473_v40 = vsel %vm57_vm6, 1.0, %v5985_v17 }
  0x9c   :  { %v46_v35 = vadd.f32 %v3471_v34, %v3470_v33 }
  0x9e   :  { %v53_v37 = vadd.f32 %v3472_v36, %v46_v35  ;;  %v63_v38 = vpop.permute.xlu1 %62  ;;  %v73_v39 = vpop.permute.xlu0 %72 }
  0x9f   :  { %vm64_vm7 = vcmp.eq.s32.totalorder %v29_v28, %v63_v38  ;;  %vm74_vm9 = vcmp.eq.s32.totalorder %v29_v28, %v73_v39  ;;  %v1177_v38 = vand.u32 4294901760, %v5061_v31  ;;  %v1184_v39 = vand.u32 4294901760, %v5064_v32 }
  0xa0   :  { %v60_v41 = vadd.f32 %v3473_v40, %v53_v37  ;;  %v3474_v42 = vsel %vm64_vm7, 1.0, %v5985_v17  ;;  %v3475_v49 = vsel %vm74_vm9, 1.0, %v5985_v17 }
  0xa1   :  { %v1178_v44 = vsub.f32 %v5061_v31, %v1177_v38 }
  0xa2   :  { %v67_v45 = vadd.f32 %v3474_v42, %v60_v41 }
  0xa3   :  { %v80_v46 = vpop.permute.xlu1 %79 }
  0xa4   :  { %v151_v48 = vsel %vm149_vm8, %v67_v45, 0  ;;  %vm81_vm10 = vcmp.eq.s32.totalorder %v29_v28, %v80_v46  ;;  %v1185_v45 = vsub.f32 %v5064_v32, %v1184_v39 }
  0xa5   :  { %v220_v51 = vand.u32 4294901760, %v151_v48  ;;  %v3476_v52 = vsel %vm81_vm10, 1.0, %v5985_v17 }
  0xa6   :  { %v84_v53 = vadd.f32 %v3476_v52, %v3475_v49  ;;  %v1179_v49 = vand.u32 4294901760, %v1178_v44  ;;  %v1186_v50 = vand.u32 4294901760, %v1185_v45 }
  0xa7   :  { %v221_v54 = vsub.f32 %v151_v48, %v220_v51 }
  0xa8   :  { %v87_v55 = vpop.permute.xlu1 %86 }
  0xa9   :  { %vm88_vm11 = vcmp.eq.s32.totalorder %v29_v28, %v87_v55  ;;  %3791 = vmatmul.mubr.f32.vlgmr.msra.gmra.mrb[0].mxu0 %v221_v54  ;;  %v222_v58 = vand.u32 4294901760, %v221_v54  ;;  %v1097_v28 = vand.u32 4294901760, %v5053_v24 }
  0xaa   :  { %v3477_v59 = vsel %vm88_vm11, 1.0, %v5985_v17  ;;  %4401 = vmatpush3.bf16.msra.mxu0 %v4999_v20  ;;  %3797 = vmatprep.mubr.msk.f32.mxu0 %vm4951_vm2, %v5985_v17 }
  0xab   :  { %v91_v60 = vadd.f32 %v3477_v59, %v84_v53  ;;  %v223_v61 = vsub.f32 %v221_v54, %v222_v58  ;;  %4402 = vmatprep.subr.bf16.mxu0 %v6004_v16  ;;  %v5071_v35 = vsub.f32 %v5053_v24, %v1097_v28 }
  0xad   :  { %v613_v0 = vsel %vm149_vm8, %v91_v60, 0  ;;  %v224_v1 = vand.u32 4294901760, %v223_v61  ;;  %v1198_v41 = vand.u32 4294901760, %v5071_v35 }
  0xae   :  { %v682_v2 = vand.u32 4294901760, %v613_v0 }
  0xaf   :  { %3777 = vmatmul.mubr.f32.vlgmr.msra.gmra.mrb[0].mxu1 %v224_v1  ;;  %v1199_v47 = vsub.f32 %v5071_v35, %v1198_v41  ;;  %v1103_v1 = vand.u32 4294901760, %v102_v63 }
  0xb0   :  { %v683_v3 = vsub.f32 %v613_v0, %v682_v2  ;;  %4395 = vmatpush3.bf16.msra.mxu1 %v4394_v26  ;;  %3783 = vmatprep.mubr.msk.f32.mxu1 %vm4951_vm2, %v5985_v17  ;;  %v1094_v26 = vand.u32 4294901760, %v99_v22  ;;  %v103_v0 = vld [vmem:[#allocation2 + $0xb0] sm:$0xff] }
  0xb1   :  { %3798 = vmatmul.mubr.f32.vlgmr.msra.gmra.mrb[0].mxu0 %v222_v58  ;;  %4408 = vmatprep.subr.bf16.mxu1 %v6004_v16  ;;  %v1200_v55 = vand.u32 4294901760, %v1199_v47 }
  0xb2   :  { %4404 = vmatpush3.bf16.msra.mxu0 %v4403_v25  ;;  %3804 = vmatprep.mubr.msk.f32.mxu0 %vm4951_vm2, %v5985_v17  ;;  %v684_v6 = vand.u32 4294901760, %v683_v3  ;;  %v5055_v25 = vld [vmem:[#allocation2 + $0x90] sm:$0xff]  ;;  %v5068_v34 = vsub.f32 %v99_v22, %v1094_v26 }
  0xb3   :  { %4405 = vmatprep.subr.bf16.mxu0 %v6004_v16  ;;  %v1100_v29 = vand.u32 4294901760, %v5055_v25 }
  0xb4   :  { %v685_v10 = vsub.f32 %v683_v3, %v684_v6  ;;  %v1191_v40 = vand.u32 4294901760, %v5068_v34 }
  0xb5   :  { %v5074_v36 = vsub.f32 %v5055_v25, %v1100_v29 }
  0xb6   :  { %v686_v12 = vand.u32 4294901760, %v685_v10  ;;  %v1192_v46 = vsub.f32 %v5068_v34, %v1191_v40  ;;  %v4478_v47 = vpack.c.bf16 %v1191_v40, %v1184_v39 }
  0xb7   :  { %3784 = vmatmul.mubr.f32.vlgmr.msra.gmra.mrb[0].mxu1 %v220_v51  ;;  %v1205_v42 = vand.u32 4294901760, %v5074_v36  ;;  %v4457_v44 = vpack.c.bf16 %v5074_v36, %v5071_v35  ;;  %v105_v35 = vld [vmem:[#allocation2 + $0xd0] sm:$0xff] }
  0xb8   :  { %4410 = vmatpush3.bf16.msra.mxu1 %v4409_v7  ;;  %3818 = vmatprep.mubr.msk.f32.mxu1 %vm4951_vm2, %v5985_v17  ;;  %v1193_v52 = vand.u32 4294901760, %v1192_v46 }
  0xb9   :  { %3805 = vmatmul.mubr.f32.vlgmr.msra.gmra.mrb[0].mxu0 %v220_v51  ;;  %4411 = vmatprep.subr.bf16.mxu1 %v6004_v16 }
  0xba   :  { %4407 = vmatpush3.bf16.msra.mxu0 %v4999_v20  ;;  %3811 = vmatprep.mubr.msk.f32.mxu0 %vm4951_vm2, %v5985_v17  ;;  %v1085_v20 = vand.u32 4294901760, %v96_v15  ;;  %v4442_v54 = vpack.c.bf16 %v1193_v52, %v1186_v50  ;;  %v110_v50 = vld [vmem:[#allocation2 + $0xf8] sm:$0xff] }
  0xbb   :  { %3819 = vmatmul.mubr.f32.vlgmr.msra.gmra.mrb[2].mxu1 %v686_v12  ;;  %4438 = vmatprep.subr.bf16.mxu0 %v6004_v16  ;;  %v5105_v12 = vpack.c.bf16 %v1094_v26, %v1091_v23  ;;  %v1643_v52 = vand.u32 4294901760, %v110_v50 }
  0xbc   :  { %4413 = vmatpush3.bf16.msra.mxu1 %v4412_v11  ;;  %3825 = vmatprep.mubr.msk.f32.mxu1 %vm4951_vm2, %v5985_v17  ;;  %v5059_v30 = vsub.f32 %v96_v15, %v1085_v20  ;;  %v5066_v33 = vpack.c.bf16 %v1088_v21, %v1085_v20 }
  0xbd   :  { %4414 = vmatprep.subr.bf16.mxu1 %v6004_v16 }
  0xbe   :  { %v1170_v37 = vand.u32 4294901760, %v5059_v30  ;;  %v4451_v24 = vpack.c.bf16 %v5061_v31, %v5059_v30  ;;  %v106_v31 = vld [vmem:[#allocation2 + $0xd8] sm:$0xff] }
  0xc0   :  { %v1171_v43 = vsub.f32 %v5059_v30, %v1170_v37  ;;  %v4475_v46 = vpack.c.bf16 %v1177_v38, %v1170_v37  ;;  %v4481_v30 = vpack.c.bf16 %v1205_v42, %v1198_v41  ;;  %v1637_v37 = vand.u32 4294901760, %v105_v35 }
  0xc1   :  { %3812 = vmatmul.mubr.f32.vlgmr.msra.gmra.mrb[0].mxu0 %v220_v51  ;;  %v1206_v51 = vsub.f32 %v5074_v36, %v1205_v42  ;;  %v107_v36 = vld [vmem:[#allocation2 + $0xe0] sm:$0xff] }
  0xc2   :  { %3891 = vmatprep.mubr.msk.f32.mxu0 %vm4951_vm2, %v5985_v17  ;;  %v1172_v48 = vand.u32 4294901760, %v1171_v43  ;;  %v1641_v38 = vand.u32 4294901760, %v107_v36 }
  0xc3   :  { %3826 = vmatmul.mubr.f32.vlgmr.msra.gmra.mrb[2].mxu1 %v682_v2  ;;  %v1207_v56 = vand.u32 4294901760, %v1206_v51  ;;  %v112_v51 = vld [vmem:[#allocation2 + $0x108] sm:$0xff] }
  0xc4   :  { %4416 = vmatpush3.bf16.msra.mxu1 %v4415_v13  ;;  %3832 = vmatprep.mubr.msk.f32.mxu1 %vm4951_vm2, %v5985_v17  ;;  %v4439_v53 = vpack.c.bf16 %v1179_v49, %v1172_v48  ;;  %v5110_v13 = vpack.c.bf16 %v1100_v29, %v1097_v28  ;;  %v4454_v28 = vpack.c.bf16 %v5068_v34, %v5064_v32  ;;  %v108_v32 = vld [vmem:[#allocation2 + $0xe8] sm:$0xff] }
  0xc5   :  { %4417 = vmatprep.subr.bf16.mxu1 %v6004_v16  ;;  %v4445_v57 = vpack.c.bf16 %v1207_v56, %v1200_v55  ;;  %v1639_v34 = vand.u32 4294901760, %v108_v32  ;;  %v5177_v42 = vpack.c.bf16 %v1641_v38, %v1637_v37  ;;  %v5179_v48 = vsub.f32 %v105_v35, %v1637_v37  ;;  %v111_v55 = vld [vmem:[#allocation2 + $0x100] sm:$0xff]  ;;  %v5239_v35 = vld [vmem:[#allocation2 + $0x130] sm:$0xff] }
  0xc6   :  { %4440 = vmatpush3.bf16.msra.mxu0 %v4439_v53  ;;  %v5181_v49 = vsub.f32 %v107_v36, %v1641_v38  ;;  %v1647_v53 = vand.u32 4294901760, %v112_v51  ;;  %v5982_v37 = vand.u32 4294901760, %v5239_v35  ;;  %v131_v38 = vld [vmem:[#allocation2 + $0x128] sm:$0xff] }
  0xc7   :  { %4441 = vmatprep.subr.bf16.mxu0 %v6004_v16  ;;  %v5175_v41 = vsub.f32 %v108_v32, %v1639_v34 }
  0xca   :  { %4443 = vmatpush3.bf16.msra.mxu0 %v4442_v54  ;;  %v109_v54 = vld [vmem:[#allocation2 + $0xf0] sm:$0xff] }
  0xcb   :  { %3833 = vmatmul.mubr.f32.vlgmr.msra.gmra.mrb[2].mxu1 %v683_v3  ;;  %4444 = vmatprep.subr.bf16.mxu0 %v6004_v16  ;;  %v1211_v3 = vsub.f32 %v102_v63, %v1103_v1  ;;  %v5191_v63 = vsub.f32 %v110_v50, %v1643_v52  ;;  %v132_v50 = vld [vmem:[#allocation2 + $0x138] sm:$0xff] }
  0xcc   :  { %4419 = vmatpush3.bf16.msra.mxu1 %v4409_v7  ;;  %3839 = vmatprep.mubr.msk.f32.mxu1 %vm4951_vm2, %v5985_v17 }
  0xcd   :  { %4420 = vmatprep.subr.bf16.mxu1 %v6004_v16  ;;  %v1212_v5 = vand.u32 4294901760, %v1211_v3 }
  0xce   :  { %4446 = vmatpush3.bf16.msra.mxu0 %v4445_v57  ;;  %v1733_v57 = vand.u32 4294901760, %v5175_v41 }
  0xcf   :  { %4447 = vmatprep.subr.bf16.mxu0 %v6004_v16 }
  0xd3   :  { %3840 = vmatmul.mubr.f32.vlgmr.msra.gmra.mrb[2].mxu1 %v684_v6 }
  0xd4   :  { %4422 = vmatpush3.bf16.msra.mxu1 %v4421_v14  ;;  %3846 = vmatprep.mubr.msk.f32.mxu1 %vm4951_vm2, %v5985_v17 }
  0xd5   :  { %4423 = vmatprep.subr.bf16.mxu1 %v6004_v16 }
  0xdb   :  { %3847 = vmatmul.mubr.f32.vlgmr.msra.gmra.mrb[2].mxu1 %v682_v2 }
  0xdc   :  { %4425 = vmatpush3.bf16.msra.mxu1 %v4409_v7  ;;  %3853 = vmatprep.mubr.msk.f32.mxu1 %vm4951_vm2, %v5985_v17  ;;  %v1213_v7 = vsub.f32 %v1211_v3, %v1212_v5 }
  0xdd   :  { %4426 = vmatprep.subr.bf16.mxu1 %v6004_v16 }
  0xde   :  { %v1214_v9 = vand.u32 4294901760, %v1213_v7 }
  0xe3   :  { %3854 = vmatmul.mubr.f32.vlgmr.msra.gmra.mrb[2].mxu1 %v682_v2  ;;  %v1106_v2 = vand.u32 4294901760, %v103_v0 }
  0xe4   :  { %3872 = vmatprep.mubr.msk.f32.mxu1 %vm4951_vm2, %v5985_v17  ;;  %4428 = vmatpush3.bf16.msra.mxu1 %v5066_v33 }
  0xe5   :  { %4429 = vmatprep.subr.bf16.mxu1 %v6004_v16  ;;  %v1218_v4 = vsub.f32 %v103_v0, %v1106_v2  ;;  %v5114_v14 = vpack.c.bf16 %v1106_v2, %v1103_v1  ;;  %v5193_v0 = vsub.f32 %v112_v51, %v1647_v53  ;;  %v2822_v51 = vand.u32 4294901760, %v131_v38 }
  0xe7   :  { %v1219_v6 = vand.u32 4294901760, %v1218_v4  ;;  %v4460_v19 = vpack.c.bf16 %v1218_v4, %v1211_v3 }
  0xe8   :  { %4431 = vmatpush3.bf16.msra.mxu1 %v5105_v12 }
  0xe9   :  { %v1220_v8 = vsub.f32 %v1218_v4, %v1219_v6  ;;  %4432 = vmatprep.subr.bf16.mxu1 %v6004_v16  ;;  %v4484_v20 = vpack.c.bf16 %v1219_v6, %v1212_v5  ;;  %v1734_v5 = vsub.f32 %v5175_v41, %v1733_v57 }
  0xeb   :  { %v1221_v10 = vand.u32 4294901760, %v1220_v8 }
  0xec   :  { %4434 = vmatpush3.bf16.msra.mxu1 %v5110_v13 }
  0xed   :  { %v4448_v11 = vpack.c.bf16 %v1221_v10, %v1214_v9  ;;  %4435 = vmatprep.subr.bf16.mxu1 %v6004_v16  ;;  %v1745_v9 = vand.u32 4294901760, %v5191_v63  ;;  %v1735_v10 = vand.u32 4294901760, %v1734_v5  ;;  %v133_v5 = vld [vmem:[#allocation2 + $0x148] sm:$0xff] }
  0xef   :  { %4449 = vmatpush3.bf16.msra.mxu0 %v4448_v11  ;;  %v1757_v11 = vand.u32 4294901760, %v5193_v0 }
  0xf0   :  { %4450 = vmatprep.subr.bf16.mxu0 %v6004_v16  ;;  %4437 = vmatpush3.bf16.msra.mxu1 %v5114_v14 }
  0xf1   :  { %v5233_v32 = vpack.c.bf16 %v1757_v11, %v1745_v9 }
 0x18a   :  { %v307_v58 = vpop.f32.mrb[0].mxu1 }
 0x18b   :  { %v3785_v59 = vpop.f32.mrb[1].mxu1 }
 0x18c   :  { %v1649_v59 = vand.u32 4294901760, %v111_v55 }
 0x18e   :  { %v5200_v4 = vsub.f32 %v111_v55, %v1649_v59 }
 0x194   :  { %v608_v60 = vpop.f32.mrb[0].mxu0 }
 0x195   :  { %v4834_v61 = vadd.f32 %v608_v60, %v307_v58  ;;  %v3813_v62 = vpop.f32.mrb[1].mxu0  ;;  %v1645_v58 = vand.u32 4294901760, %v109_v54  ;;  %v1727_v60 = vand.u32 4294901760, %v5179_v48 }
 0x196   :  { %v5189_v62 = vpack.c.bf16 %v1647_v53, %v1643_v52  ;;  %v2825_v52 = vand.u32 4294901760, %v132_v50  ;;  %v5243_v53 = vld [vmem:[#allocation2 + $0x140] sm:$0xff] }
 0x197   :  { %v5196_v2 = vpack.c.bf16 %v1649_v59, %v1645_v58  ;;  %v5198_v3 = vsub.f32 %v109_v54, %v1645_v58  ;;  %v1728_v7 = vsub.f32 %v5179_v48, %v1727_v60  ;;  %v5245_v54 = vld [vmem:[#allocation2 + $0x150] sm:$0xff]  ;;  %v5260_v59 = vsub.f32 %v131_v38, %v2822_v51 }
 0x198   :  { %v5258_v58 = vpack.c.bf16 %v2825_v52, %v2822_v51 }
 0x19a   :  { %6059 = vst [vmem:[#allocation5_spill] sm:$0xff] %v5258_v58 }
 0x1b6   :  { %v1070_v15 = vpop.f32.mrb[2].mxu1 }
 0x1b7   :  { %1075 = vrot.lane.b32.xlu0 %v1070_v15, %s4953_s0  ;;  %v3855_v18 = vpop.f32.mrb[3].mxu1 }
 0x1b8   :  { %v1746_v18 = vsub.f32 %v5191_v63, %v1745_v9 }
 0x229   :  { %v1076_v21 = vpop.permute.xlu0 %1075 }
 0x22a   :  { %v1079_v22 = vsel %vm1078_vm12, %v4834_v61, %v1076_v21  ;;  %v1739_v61 = vand.u32 4294901760, %v5181_v49 }
 0x22b   :  { %v1082_v23 = vsel %vm1080_vm13, %v1079_v22, 0 }
 0x22c   :  { %v1157_v25 = vand.u32 4294901760, %v1082_v23  ;;  %v1740_v8 = vsub.f32 %v5181_v49, %v1739_v61 }
 0x22e   :  { %v1158_v26 = vsub.f32 %v1082_v23, %v1157_v25  ;;  %3892 = vmatmul.mubr.f32.vlgmr.msra.gmra.mrb[2].mxu0 %v1157_v25  ;;  %v1741_v15 = vand.u32 4294901760, %v1740_v8  ;;  %v2828_v8 = vand.u32 4294901760, %v133_v5 }
 0x22f   :  { %4452 = vmatpush3.bf16.msra.mxu0 %v4451_v24  ;;  %3910 = vmatprep.mubr.msk.f32.mxu0 %vm4951_vm2, %v5985_v17  ;;  %v1747_v24 = vand.u32 4294901760, %v1746_v18 }
 0x230   :  { %v1159_v29 = vand.u32 4294901760, %v1158_v26  ;;  %4453 = vmatprep.subr.bf16.mxu0 %v6004_v16 }
 0x232   :  { %v1160_v43 = vsub.f32 %v1158_v26, %v1159_v29 }
 0x233   :  { %4455 = vmatpush3.bf16.msra.mxu0 %v4454_v28 }
 0x234   :  { %4456 = vmatprep.subr.bf16.mxu0 %v6004_v16  ;;  %v1161_v45 = vand.u32 4294901760, %v1160_v43 }
 0x236   :  { %3873 = vmatmul.mubr.f32.vlgmr.msra.gmra.mrb[4].mxu1 %v1161_v45 }
 0x237   :  { %4458 = vmatpush3.bf16.msra.mxu0 %v4457_v44  ;;  %1707 = vmatprep.mubr.f32.mxu1 %v5985_v17 }
 0x238   :  { %4459 = vmatprep.subr.bf16.mxu0 %v6004_v16 }
 0x23b   :  { %4461 = vmatpush3.bf16.msra.mxu0 %v4460_v19 }
 0x23c   :  { %4462 = vmatprep.subr.bf16.mxu0 %v6004_v16 }
 0x23e   :  { %3911 = vmatmul.mubr.f32.vlgmr.msra.gmra.mrb[2].mxu0 %v1158_v26 }
 0x23f   :  { %4464 = vmatpush3.bf16.msra.mxu0 %v5066_v33  ;;  %3929 = vmatprep.mubr.msk.f32.mxu0 %vm4951_vm2, %v5985_v17 }
 0x240   :  { %4465 = vmatprep.subr.bf16.mxu0 %v6004_v16 }
 0x243   :  { %4467 = vmatpush3.bf16.msra.mxu0 %v5105_v12 }
 0x244   :  { %4468 = vmatprep.subr.bf16.mxu0 %v6004_v16 }
 0x247   :  { %4470 = vmatpush3.bf16.msra.mxu0 %v5110_v13 }
 0x248   :  { %4471 = vmatprep.subr.bf16.mxu0 %v6004_v16 }
 0x24b   :  { %4473 = vmatpush3.bf16.msra.mxu0 %v5114_v14 }
 0x24c   :  { %4474 = vmatprep.subr.bf16.mxu0 %v6004_v16 }
 0x24e   :  { %3930 = vmatmul.mubr.f32.vlgmr.msra.gmra.mrb[2].mxu0 %v1159_v29 }
 0x24f   :  { %4476 = vmatpush3.bf16.msra.mxu0 %v4475_v46  ;;  %3948 = vmatprep.mubr.msk.f32.mxu0 %vm4951_vm2, %v5985_v17 }
 0x250   :  { %4477 = vmatprep.subr.bf16.mxu0 %v6004_v16 }
 0x253   :  { %4479 = vmatpush3.bf16.msra.mxu0 %v4478_v47 }
 0x254   :  { %4480 = vmatprep.subr.bf16.mxu0 %v6004_v16 }
 0x257   :  { %4482 = vmatpush3.bf16.msra.mxu0 %v4481_v30 }
 0x258   :  { %4483 = vmatprep.subr.bf16.mxu0 %v6004_v16 }
 0x25b   :  { %4485 = vmatpush3.bf16.msra.mxu0 %v4484_v20  ;;  %v1758_v20 = vsub.f32 %v5193_v0, %v1757_v11  ;;  %v5278_v11 = vld [vmem:[#allocation2 + $0x170] sm:$0xff] }
 0x25c   :  { %4486 = vmatprep.subr.bf16.mxu0 %v6004_v16 }
 0x25e   :  { %3949 = vmatmul.mubr.f32.vlgmr.msra.gmra.mrb[2].mxu0 %v1157_v25 }
 0x25f   :  { %4488 = vmatpush3.bf16.msra.mxu0 %v5066_v33  ;;  %3967 = vmatprep.mubr.msk.f32.mxu0 %vm4951_vm2, %v5985_v17  ;;  %v1635_v33 = vand.u32 4294901760, %v106_v31 }
 0x260   :  { %4489 = vmatprep.subr.bf16.mxu0 %v6004_v16 }
 0x261   :  { %v5171_v39 = vpack.c.bf16 %v1639_v34, %v1635_v33  ;;  %v5173_v40 = vsub.f32 %v106_v31, %v1635_v33  ;;  %v5231_v31 = vpack.c.bf16 %v1739_v61, %v1727_v60  ;;  %v5237_v34 = vld [vmem:[#allocation2 + $0x120] sm:$0xff]  ;;  %v5262_v60 = vsub.f32 %v132_v50, %v2825_v52 }
 0x262   :  { %v5983_v36 = vand.u32 4294901760, %v5237_v34  ;;  %v5980_v61 = vand.u32 4294901760, %v5245_v54 }
 0x263   :  { %4491 = vmatpush3.bf16.msra.mxu0 %v5105_v12  ;;  %4499 = vmatprep.subr.bf16.mxu1 %v5171_v39  ;;  %v1721_v56 = vand.u32 4294901760, %v5173_v40  ;;  %v1751_v12 = vand.u32 4294901760, %v5198_v3 }
 0x264   :  { %4492 = vmatprep.subr.bf16.mxu0 %v6004_v16  ;;  %4501 = vmatpush1.bf16.msra.mxu1 %v5177_v42  ;;  %v5250_v55 = vsub.f32 %v5237_v34, %v5983_v36 }
 0x265   :  { %v1722_v1 = vsub.f32 %v5173_v40, %v1721_v56  ;;  %4503 = vmatprep.subr.bf16.mxu1 %v5189_v62  ;;  %v1752_v21 = vsub.f32 %v5198_v3, %v1751_v12  ;;  %v5229_v30 = vpack.c.bf16 %v1733_v57, %v1721_v56  ;;  %v5255_v56 = vsub.f32 %v5239_v35, %v5982_v37 }
 0x266   :  { %v5981_v57 = vand.u32 4294901760, %v5243_v53 }
 0x267   :  { %4494 = vmatpush3.bf16.msra.mxu0 %v5110_v13  ;;  %v1723_v6 = vand.u32 4294901760, %v1722_v1  ;;  %v1763_v13 = vand.u32 4294901760, %v5200_v4  ;;  %v1753_v26 = vand.u32 4294901760, %v1752_v21  ;;  %v135_v21 = vld [vmem:[#allocation2 + $0x168] sm:$0xff] }
 0x268   :  { %4495 = vmatprep.subr.bf16.mxu0 %v6004_v16  ;;  %4505 = vmatpush1.bf16.msra.mxu1 %v5196_v2  ;;  %v5268_v1 = vsub.f32 %v5243_v53, %v5981_v57 }
 0x269   :  { %v4506_v19 = vpack.c.bf16 %v1735_v10, %v1723_v6  ;;  %v1764_v22 = vsub.f32 %v5200_v4, %v1763_v13  ;;  %v5235_v33 = vpack.c.bf16 %v1763_v13, %v1751_v12  ;;  %v134_v6 = vld [vmem:[#allocation2 + $0x158] sm:$0xff]  ;;  %v5276_v10 = vld [vmem:[#allocation2 + $0x160] sm:$0xff]  ;;  %v5976_v13 = vand.u32 4294901760, %v5278_v11 }
 0x26a   :  { %v2831_v9 = vand.u32 4294901760, %v134_v6  ;;  %v5977_v12 = vand.u32 4294901760, %v5276_v10 }
 0x26b   :  { %4497 = vmatpush3.bf16.msra.mxu0 %v5114_v14  ;;  %v1729_v14 = vand.u32 4294901760, %v1728_v7  ;;  %4507 = vmatprep.subr.bf16.mxu1 %v4506_v19  ;;  %v1765_v28 = vand.u32 4294901760, %v1764_v22  ;;  %v5274_v7 = vsub.f32 %v5245_v54, %v5980_v61  ;;  %v136_v22 = vld [vmem:[#allocation2 + $0x178] sm:$0xff] }
 0x26c   :  { %4690 = vmatprep.subr.bf16.mxu0 %v6004_v16  ;;  %v5287_v18 = vsub.f32 %v134_v6, %v2831_v9  ;;  %v5292_v19 = vsub.f32 %v5276_v10, %v5977_v12  ;;  %v2843_v12 = vand.u32 4294901760, %v138_v27 }
 0x26d   :  { %v5215_v23 = vpack.c.bf16 %v1741_v15, %v1729_v14  ;;  %v5219_v43 = vpack.c.bf16 %v1765_v28, %v1753_v26  ;;  %v5283_v14 = vpack.c.bf16 %v2831_v9, %v2828_v8  ;;  %v5285_v15 = vsub.f32 %v133_v5, %v2828_v8  ;;  %v5300_v26 = vld [vmem:[#allocation2 + $0x180] sm:$0xff]  ;;  %v5302_v28 = vld [vmem:[#allocation2 + $0x190] sm:$0xff]  ;;  %v137_v9 = vld [vmem:[#allocation2 + $0x188] sm:$0xff] }
 0x26e   :  { %3968 = vmatmul.mubr.f32.vlgmr.msra.gmra.mrb[2].mxu0 %v1157_v25  ;;  %v1759_v25 = vand.u32 4294901760, %v1758_v20  ;;  %v5297_v20 = vsub.f32 %v5278_v11, %v5976_v13  ;;  %v5978_v38 = vand.u32 4294901760, %v5300_v26  ;;  %v5979_v50 = vand.u32 4294901760, %v5302_v28 }
 0x26f   :  { %4212 = vmatprep.mubr.msk.f32.mxu0 %vm4951_vm2, %v5985_v17  ;;  %4692 = vmatpush3.bf16.msra.mxu0 %v5258_v58  ;;  %6060 = vst [vmem:[#allocation6_spill] sm:$0xff] %v5283_v14  ;;  %v2840_v13 = vand.u32 4294901760, %v137_v9  ;;  %v5335_v61 = vsub.f32 %v138_v27, %v2843_v12 }
 0x270   :  { %v5217_v29 = vpack.c.bf16 %v1759_v25, %v1747_v24  ;;  %4693 = vmatprep.subr.bf16.mxu0 %v6004_v16  ;;  %v2834_v24 = vand.u32 4294901760, %v135_v21  ;;  %v2837_v25 = vand.u32 4294901760, %v136_v22  ;;  %v5316_v6 = vsub.f32 %v5300_v26, %v5978_v38 }
 0x271   :  { %v5321_v8 = vsub.f32 %v5302_v28, %v5979_v50  ;;  %v5331_v38 = vpack.c.bf16 %v2843_v12, %v2840_v13  ;;  %v5333_v50 = vsub.f32 %v137_v9, %v2840_v13  ;;  %v104_v13 = vld [vmem:[#allocation2 + $0xc0] ss:$0 sm:$0xff] }
 0x272   :  { %v5307_v51 = vpack.c.bf16 %v2837_v25, %v2834_v24  ;;  %v5309_v52 = vsub.f32 %v135_v21, %v2834_v24  ;;  %v5311_v5 = vsub.f32 %v136_v22, %v2837_v25  ;;  %v5324_v21 = vld [vmem:[#allocation2 + $0x1a0] sm:$0xff]  ;;  %v5326_v22 = vld [vmem:[#allocation2 + $0x1b0] sm:$0xff] }
 0x273   :  { %4695 = vmatpush3.bf16.msra.mxu0 %v5283_v14  ;;  %v5984_v24 = vand.u32 4294901760, %v5324_v21  ;;  %v5991_v25 = vand.u32 4294901760, %v5326_v22  ;;  %6062 = vst [vmem:[#allocation8_spill] sm:$0xff] %v5331_v38 }
 0x274   :  { %4696 = vmatprep.subr.bf16.mxu0 %v6004_v16  ;;  %6061 = vst [vmem:[#allocation7_spill] sm:$0xff] %v5307_v51 }
 0x275   :  { %v5340_v57 = vsub.f32 %v5324_v21, %v5984_v24  ;;  %v5345_v37 = vsub.f32 %v5326_v22, %v5991_v25  ;;  %v6063_v25 = vmov 0.0  }
 0x277   :  { %4698 = vmatpush3.bf16.msra.mxu0 %v5307_v51 }
 0x278   :  { %4699 = vmatprep.subr.bf16.mxu0 %v6004_v16 }
 0x27b   :  { %4701 = vmatpush3.bf16.msra.mxu0 %v5331_v38 }
 0x27c   :  { %4702 = vmatprep.subr.bf16.mxu0 %v6004_v16 }
 0x309   :  { %v1163_v36 = vpop.f32.mrb[4].mxu1 }
 0x30a   :  { %v3874_v47 = vpop.f32.mrb[5].mxu1  ;;  %v1164_v9 = vadd.f32 %v1163_v36, %v104_v13  ;;  %v143_v13 = vld [vmem:[#allocation2 + $0x1e8] sm:$0xff] }
 0x30b   :  { %v6064_v47 = vpack.c.bf16 %v5175_v41, %v5173_v40  ;;  %v6069_v40 = vand.u32 4294901760, %v5239_v35  ;;  %v126_v35 = vld [vmem:[#allocation2 + $0x1d0] sm:$0xff] }
 0x341   :  { %v1617_v27 = vpop.f32.mrb[2].mxu0 }
 0x342   :  { %v4836_v12 = vadd.f32 %v1617_v27, %v1164_v9  ;;  %v3969_v46 = vpop.f32.mrb[3].mxu0  ;;  %v144_v9 = vld [vmem:[#allocation2 + $0x1f8] sm:$0xff]  ;;  %v2858_v27 = vand.u32 4294901760, %v143_v13 }
 0x343   :  { %v139_v46 = vld [vmem:[#allocation2 + $0x1a8] sm:$0xff] }
 0x344   :  { %v1633_v45 = vsel %vm1078_vm12, %v4836_v12, 0  ;;  %v2861_v12 = vand.u32 4294901760, %v144_v9 }
 0x345   :  { %v1708_v24 = vand.u32 4294901760, %v1633_v45 }
 0x347   :  { %v1709_v44 = vsub.f32 %v1633_v45, %v1708_v24  ;;  %v6065_v45 = vpack.c.bf16 %v5181_v49, %v5179_v48  ;;  %v6074_v49 = vand.u32 4294901760, %v5276_v10  ;;  %v142_v10 = vld [vmem:[#allocation2 + $0x1d8] sm:$0xff] }
 0x349   :  { %v1710_v17 = vand.u32 4294901760, %v1709_v44 }
 0x34b   :  { %v1711_v51 = vsub.f32 %v1709_v44, %v1710_v17 }
 0x34d   :  { %v1712_v14 = vand.u32 4294901760, %v1711_v51  ;;  %v127_v51 = vld [vmem:[#allocation2 + $0x1e0] sm:$0xff] }
 0x34f   :  { %1713 = vmatmul.mubr.f32.vlgmr.msra.gmra.mrb[6].mxu1 %v1712_v14  ;;  %v2855_v14 = vand.u32 4294901760, %v142_v10 }
 0x350   :  { %4509 = vmatpush1.bf16.msra.mxu1 %v5215_v23  ;;  %1823 = vmatprep.mubr.f32.mxu1 %v6063_v25  ;;  %v6066_v23 = vpack.c.bf16 %v5193_v0, %v5191_v63  ;;  %v6077_v0 = vand.u32 4294901760, %v5300_v26 }
 0x351   :  { %4511 = vmatprep.subr.bf16.mxu1 %v5217_v29  ;;  %v6067_v29 = vpack.c.bf16 %v5200_v4, %v5198_v3  ;;  %v6080_v4 = vand.u32 4294901760, %v5324_v21  ;;  %v128_v21 = vld [vmem:[#allocation2 + $0x1f0] sm:$0xff] }
 0x354   :  { %4513 = vmatpush1.bf16.msra.mxu1 %v5219_v43  ;;  %v6081_v43 = vand.u32 4294901760, %v5326_v22  ;;  %v2217_v22 = vand.u32 4294901760, %v127_v51 }
 0x355   :  { %4515 = vmatprep.subr.bf16.mxu1 %v6064_v47 }
 0x357   :  { %1825 = vmatmul.mubr.f32.vlgmr.msra.gmra.mrb[6].mxu1 %v1708_v24 }
 0x358   :  { %4517 = vmatpush1.bf16.msra.mxu1 %v6065_v45  ;;  %1911 = vmatprep.mubr.f32.mxu1 %v6063_v25  ;;  %v5439_v45 = vpack.c.bf16 %v2861_v12, %v2858_v27 }
 0x359   :  { %4519 = vmatprep.subr.bf16.mxu1 %v6066_v23  ;;  %v129_v23 = vld [vmem:[#allocation2 + $0x200] sm:$0xff] }
 0x35a   :  { %6087 = vst [vmem:[#allocation18_spill] sm:$0xff] %v5439_v45 }
 0x35c   :  { %4521 = vmatpush1.bf16.msra.mxu1 %v6067_v29  ;;  %v130_v29 = vld [vmem:[#allocation2 + $0x210] sm:$0xff] }
 0x35d   :  { %4523 = vmatprep.subr.bf16.mxu1 %v5171_v39 }
 0x35f   :  { %1914 = vmatmul.mubr.f32.vlgmr.msra.gmra.mrb[6].mxu1 %v1709_v44  ;;  %v5420_v44 = vpack.c.bf16 %v6081_v43, %v6080_v4 }
 0x360   :  { %4525 = vmatpush1.bf16.msra.mxu1 %v5177_v42  ;;  %1992 = vmatprep.mubr.f32.mxu1 %v6063_v25 }
 0x361   :  { %4527 = vmatprep.subr.bf16.mxu1 %v5189_v62  ;;  %6082 = vst [vmem:[#allocation13_spill] sm:$0xff] %v5420_v44 }
 0x364   :  { %4529 = vmatpush1.bf16.msra.mxu1 %v5196_v2 }
 0x365   :  { %4531 = vmatprep.subr.bf16.mxu1 %v5229_v30  ;;  %v140_v30 = vld [vmem:[#allocation2 + $0x1b8] sm:$0xff] }
 0x367   :  { %1996 = vmatmul.mubr.f32.vlgmr.msra.gmra.mrb[6].mxu1 %v1710_v17  ;;  %v6068_v17 = vand.u32 4294901760, %v5237_v34  ;;  %v125_v34 = vld [vmem:[#allocation2 + $0x1c0] sm:$0xff] }
 0x368   :  { %4533 = vmatpush1.bf16.msra.mxu1 %v5231_v31  ;;  %2090 = vmatprep.mubr.f32.mxu1 %v6063_v25  ;;  %v2846_v31 = vand.u32 4294901760, %v139_v46  ;;  %v2211_v36 = vand.u32 4294901760, %v125_v34 }
 0x369   :  { %4535 = vmatprep.subr.bf16.mxu1 %v5233_v32  ;;  %v5386_v41 = vpack.c.bf16 %v6069_v40, %v6068_v17  ;;  %v2849_v32 = vand.u32 4294901760, %v140_v30  ;;  %v2223_v17 = vand.u32 4294901760, %v129_v23  ;;  %v2226_v40 = vand.u32 4294901760, %v130_v29 }
 0x36b   :  { %6070 = vst [vmem:[#allocation9_spill] sm:$0xff] %v5386_v41  ;;  %v5446_v4 = vpack.c.bf16 %v2226_v40, %v2223_v17 }
 0x36c   :  { %4537 = vmatpush1.bf16.msra.mxu1 %v5235_v33  ;;  %v5425_v33 = vpack.c.bf16 %v2849_v32, %v2846_v31 }
 0x36d   :  { %4539 = vmatprep.subr.bf16.mxu1 %v5171_v39  ;;  %v6071_v39 = vand.u32 4294901760, %v5243_v53  ;;  %v2214_v53 = vand.u32 4294901760, %v126_v35  ;;  %6088 = vst [vmem:[#allocation19_spill] sm:$0xff] %v5446_v4 }
 0x36e   :  { %6083 = vst [vmem:[#allocation14_spill] sm:$0xff] %v5425_v33  ;;  %4704 = vmatpush3.bf16.msra.mxu0 %v5425_v33  ;;  %v5459_v33 = vsub.f32 %v139_v46, %v2846_v31  ;;  %v5479_v31 = vsub.f32 %v144_v9, %v2861_v12 }
 0x36f   :  { %2092 = vmatmul.mubr.f32.vlgmr.msra.gmra.mrb[6].mxu1 %v1708_v24  ;;  %v5428_v26 = vpack.c.bf16 %v2214_v53, %v2211_v36  ;;  %4705 = vmatprep.subr.bf16.mxu0 %v6004_v16 }
 0x370   :  { %4541 = vmatpush1.bf16.msra.mxu1 %v5177_v42  ;;  %2170 = vmatprep.mubr.f32.mxu1 %v6063_v25  ;;  %v6072_v42 = vand.u32 4294901760, %v5245_v54  ;;  %v141_v54 = vld [vmem:[#allocation2 + $0x1c8] sm:$0xff] }
 0x371   :  { %4543 = vmatprep.subr.bf16.mxu1 %v5189_v62  ;;  %v6075_v62 = vand.u32 4294901760, %v5278_v11  ;;  %v2852_v11 = vand.u32 4294901760, %v141_v54  ;;  %6084 = vst [vmem:[#allocation15_spill] sm:$0xff] %v5428_v26 }
 0x372   :  { %v5394_v48 = vpack.c.bf16 %v6072_v42, %v6071_v39  ;;  %v145_v39 = vld [vmem:[#allocation2 + $0x208] sm:$0xff]  ;;  %v146_v42 = vld [vmem:[#allocation2 + $0x218] sm:$0xff] }
 0x373   :  { %v5404_v63 = vpack.c.bf16 %v6075_v62, %v6074_v49  ;;  %v6010_v49 = vand.u32 4294901760, %v5250_v55  ;;  %v6013_v62 = vand.u32 4294901760, %v5255_v56 }
 0x374   :  { %4545 = vmatpush1.bf16.msra.mxu1 %v5196_v2  ;;  %6073 = vst [vmem:[#allocation10_spill] sm:$0xff] %v5394_v48  ;;  %v6078_v2 = vand.u32 4294901760, %v5302_v28  ;;  %v5431_v28 = vpack.c.bf16 %v2855_v14, %v2852_v11 }
 0x375   :  { %4546 = vmatprep.subr.bf16.mxu1 %v6004_v16  ;;  %6076 = vst [vmem:[#allocation11_spill] sm:$0xff] %v5404_v63  ;;  %v2275_v43 = vsub.f32 %v5250_v55, %v6010_v49  ;;  %v5466_v49 = vsub.f32 %v126_v35, %v2214_v53  ;;  %v5484_v35 = vsub.f32 %v130_v29, %v2226_v40 }
 0x376   :  { %v5412_v3 = vpack.c.bf16 %v6078_v2, %v6077_v0  ;;  %6085 = vst [vmem:[#allocation16_spill] sm:$0xff] %v5431_v28  ;;  %4707 = vmatpush3.bf16.msra.mxu0 %v5431_v28  ;;  %v2864_v0 = vand.u32 4294901760, %v145_v39  ;;  %v2867_v2 = vand.u32 4294901760, %v146_v42 }
 0x377   :  { %2172 = vmatmul.mubr.f32.vlgmr.msra.gmra.mrb[6].mxu1 %v1708_v24  ;;  %v2220_v24 = vand.u32 4294901760, %v128_v21  ;;  %4708 = vmatprep.subr.bf16.mxu0 %v6004_v16 }
 0x378   :  { %4548 = vmatpush3.bf16.msra.mxu1 %v5386_v41  ;;  %4002 = vmatprep.mubr.msk.f32.mxu1 %vm4951_vm2, %v6063_v25  ;;  %6079 = vst [vmem:[#allocation12_spill] sm:$0xff] %v5412_v3  ;;  %v5455_v28 = vpack.c.bf16 %v2867_v2, %v2864_v0  ;;  %v5488_v53 = vsub.f32 %v146_v42, %v2867_v2  ;;  %v6017_v42 = vand.u32 4294901760, %v5309_v52 }
 0x379   :  { %4549 = vmatprep.subr.bf16.mxu1 %v6004_v16  ;;  %v5436_v47 = vpack.c.bf16 %v2220_v24, %v2217_v22  ;;  %v5475_v46 = vsub.f32 %v128_v21, %v2220_v24  ;;  %v6024_v21 = vand.u32 4294901760, %v5274_v7  ;;  %v6021_v24 = vand.u32 4294901760, %v5287_v18 }
 0x37a   :  { %4710 = vmatpush3.bf16.msra.mxu0 %v5439_v45  ;;  %6089 = vst [vmem:[#allocation20_spill] sm:$0xff] %v5455_v28  ;;  %v5473_v45 = vsub.f32 %v127_v51, %v2217_v22  ;;  %v6025_v51 = vand.u32 4294901760, %v5268_v1  ;;  %v6022_v22 = vand.u32 4294901760, %v5285_v15 }
 0x37b   :  { %6086 = vst [vmem:[#allocation17_spill] sm:$0xff] %v5436_v47  ;;  %4711 = vmatprep.subr.bf16.mxu0 %v6004_v16  ;;  %6091 = vst [vmem:[#allocation22_spill] sm:$0xff] %v5475_v46  ;;  %v2296_v12 = vsub.f32 %v5274_v7, %v6024_v21 }
 0x37c   :  { %4551 = vmatpush3.bf16.msra.mxu1 %v5394_v48  ;;  %6090 = vst [vmem:[#allocation21_spill] sm:$0xff] %v5473_v45  ;;  %v2289_v9 = vsub.f32 %v5268_v1, %v6025_v51 }
 0x37d   :  { %4552 = vmatprep.subr.bf16.mxu1 %v6004_v16 }
 0x37e   :  { %4713 = vmatpush3.bf16.msra.mxu0 %v5455_v28  ;;  %v2290_v40 = vand.u32 4294901760, %v2289_v9 }
 0x380   :  { %4554 = vmatpush3.bf16.msra.mxu1 %v5404_v63  ;;  %v5468_v63 = vsub.f32 %v141_v54, %v2852_v11 }
 0x381   :  { %4555 = vmatprep.subr.bf16.mxu1 %v6004_v16 }
 0x384   :  { %4557 = vmatpush3.bf16.msra.mxu1 %v5412_v3  ;;  %v5464_v3 = vsub.f32 %v125_v34, %v2211_v36  ;;  %v5482_v34 = vsub.f32 %v129_v23, %v2223_v17  ;;  %v5486_v36 = vsub.f32 %v145_v39, %v2864_v0  ;;  %v2937_v23 = vsub.f32 %v5287_v18, %v6021_v24 }
 0x385   :  { %4558 = vmatprep.subr.bf16.mxu1 %v6004_v16  ;;  %v2297_v0 = vand.u32 4294901760, %v2296_v12  ;;  %v6020_v12 = vand.u32 4294901760, %v5333_v50 }
 0x386   :  { %v6029_v21 = vand.u32 4294901760, %v5464_v3 }
 0x388   :  { %4560 = vmatpush3.bf16.msra.mxu1 %v5420_v44  ;;  %v5461_v44 = vsub.f32 %v140_v30, %v2849_v32  ;;  %v5477_v30 = vsub.f32 %v143_v13, %v2858_v27  ;;  %v6093_v32 = vmov 0.0|0.0   ;;  %v6014_v13 = vand.u32 4294901760, %v5292_v19 }
 0x389   :  { %4561 = vmatprep.subr.bf16.mxu1 %v6004_v16  ;;  %4714 = vmatprep.subr.bf16.mxu0 %v6093_v32  ;;  %v6015_v27 = vand.u32 4294901760, %v5297_v20 }
 0x38a   :  { %6092 = vst [vmem:[#allocation23_spill] sm:$0xff] %v5477_v30  ;;  %v2303_v29 = vsub.f32 %v5292_v19, %v6014_v13  ;;  %v6016_v13 = vand.u32 4294901760, %v5311_v5 }
 0x38b   :  { %v2310_v39 = vsub.f32 %v5297_v20, %v6015_v27  ;;  %v6019_v27 = vand.u32 4294901760, %v5321_v8 }
 0x38c   :  { %4563 = vmatpush3.bf16.msra.mxu1 %v5428_v26  ;;  %v6031_v26 = vand.u32 4294901760, %v5262_v60 }
 0x38d   :  { %4564 = vmatprep.subr.bf16.mxu1 %v6004_v16 }
 0x390   :  { %4566 = vmatpush3.bf16.msra.mxu1 %v5436_v47  ;;  %v2282_v47 = vsub.f32 %v5255_v56, %v6013_v62  ;;  %v5470_v62 = vsub.f32 %v142_v10, %v2855_v14  ;;  %v6094_v10 = vand.u32 4294901760, %v5260_v59  ;;  %v2923_v14 = vsub.f32 %v5262_v60, %v6031_v26 }
 0x391   :  { %4567 = vmatprep.subr.bf16.mxu1 %v6004_v16  ;;  %v2276_v16 = vand.u32 4294901760, %v2275_v43  ;;  %v2938_v43 = vand.u32 4294901760, %v2937_v23 }
 0x392   :  { %v2283_v38 = vand.u32 4294901760, %v2282_v47  ;;  %v2916_v11 = vsub.f32 %v5260_v59, %v6094_v10  ;;  %v2930_v47 = vsub.f32 %v5285_v15, %v6022_v22  ;;  %v2304_v10 = vand.u32 4294901760, %v2303_v29 }
 0x393   :  { %v2951_v29 = vsub.f32 %v5311_v5, %v6016_v13  ;;  %v6028_v13 = vand.u32 4294901760, %v5459_v33 }
 0x394   :  { %4569 = vmatpush3.bf16.msra.mxu1 %v5446_v4  ;;  %v5491_v54 = vpack.c.bf16 %v2283_v38, %v2276_v16  ;;  %v2917_v16 = vand.u32 4294901760, %v2916_v11  ;;  %v2924_v38 = vand.u32 4294901760, %v2923_v14  ;;  %v2931_v2 = vand.u32 4294901760, %v2930_v47 }
 0x395   :  { %4570 = vmatprep.subr.bf16.mxu1 %v6093_v32  ;;  %v2311_v11 = vand.u32 4294901760, %v2310_v39  ;;  %v2944_v14 = vsub.f32 %v5309_v52, %v6017_v42  ;;  %v6049_v4 = vand.u32 4294901760, %v5486_v36 }
 0x396   :  { %v5520_v17 = vpack.c.bf16 %v2924_v38, %v2917_v16  ;;  %v6018_v16 = vand.u32 4294901760, %v5316_v6  ;;  %v5531_v38 = vpack.c.bf16 %v2297_v0, %v2290_v40  ;;  %v5533_v9 = vpack.c.bf16 %v2938_v43, %v2931_v2 }
 0x397   :  { %v5537_v47 = vpack.c.bf16 %v2311_v11, %v2304_v10  ;;  %v2945_v23 = vand.u32 4294901760, %v2944_v14  ;;  %v2324_v40 = vsub.f32 %v5321_v8, %v6019_v27  ;;  %v2958_v0 = vsub.f32 %v5333_v50, %v6020_v12 }
 0x398   :  { %v2317_v39 = vsub.f32 %v5316_v6, %v6018_v16  ;;  %v6023_v2 = vand.u32 4294901760, %v5335_v61  ;;  %v6026_v43 = vand.u32 4294901760, %v5340_v57  ;;  %v2952_v10 = vand.u32 4294901760, %v2951_v29 }
 0x399   :  { %v6027_v14 = vand.u32 4294901760, %v5345_v37  ;;  %v2325_v42 = vand.u32 4294901760, %v2324_v40  ;;  %v2959_v16 = vand.u32 4294901760, %v2958_v0  ;;  %v6030_v40 = vand.u32 4294901760, %v5461_v44 }
 0x39a   :  { %v2318_v11 = vand.u32 4294901760, %v2317_v39  ;;  %v2965_v27 = vsub.f32 %v5335_v61, %v6023_v2  ;;  %v2331_v12 = vsub.f32 %v5340_v57, %v6026_v43  ;;  %v5561_v24 = vpack.c.bf16 %v2952_v10, %v2945_v23 }
 0x39b   :  { %v2338_v29 = vsub.f32 %v5345_v37, %v6027_v14  ;;  %v2972_v39 = vsub.f32 %v5459_v33, %v6028_v13  ;;  %v2979_v23 = vsub.f32 %v5461_v44, %v6030_v40  ;;  %v6032_v10 = vand.u32 4294901760, %v5466_v49 }
 0x39c   :  { %v5570_v0 = vpack.c.bf16 %v2325_v42, %v2318_v11  ;;  %v2966_v22 = vand.u32 4294901760, %v2965_v27  ;;  %v2332_v2 = vand.u32 4294901760, %v2331_v12  ;;  %v2345_v13 = vsub.f32 %v5464_v3, %v6029_v21 }
 0x39d   :  { %v2339_v51 = vand.u32 4294901760, %v2338_v29  ;;  %v2973_v43 = vand.u32 4294901760, %v2972_v39  ;;  %v6033_v42 = vand.u32 4294901760, %v5468_v63  ;;  %v6037_v27 = vand.u32 4294901760, %v5470_v62 }
 0x39e   :  { %v5577_v14 = vpack.c.bf16 %v2966_v22, %v2959_v16  ;;  %v2980_v11 = vand.u32 4294901760, %v2979_v23  ;;  %v2352_v29 = vsub.f32 %v5466_v49, %v6032_v10  ;;  %v2346_v39 = vand.u32 4294901760, %v2345_v13 }
 0x39f   :  { %v5584_v12 = vpack.c.bf16 %v2339_v51, %v2332_v2  ;;  %v2986_v22 = vsub.f32 %v5468_v63, %v6033_v42  ;;  %v2993_v16 = vsub.f32 %v5470_v62, %v6037_v27  ;;  %v6036_v21 = vand.u32 4294901760, %v5473_v45 }
 0x3a0   :  { %v5596_v40 = vpack.c.bf16 %v2980_v11, %v2973_v43  ;;  %v2353_v51 = vand.u32 4294901760, %v2352_v29  ;;  %v6040_v2 = vand.u32 4294901760, %v5475_v46  ;;  %v6041_v23 = vand.u32 4294901760, %v5477_v30 }
 0x3a1   :  { %v2987_v26 = vand.u32 4294901760, %v2986_v22  ;;  %v2994_v10 = vand.u32 4294901760, %v2993_v16  ;;  %v2359_v13 = vsub.f32 %v5473_v45, %v6036_v21  ;;  %v6042_v42 = vand.u32 4294901760, %v5479_v31 }
 0x3a2   :  { %v5604_v28 = vpack.c.bf16 %v2353_v51, %v2346_v39  ;;  %v2366_v43 = vsub.f32 %v5475_v46, %v6040_v2  ;;  %v3000_v11 = vsub.f32 %v5477_v30, %v6041_v23  ;;  %v6043_v21 = vand.u32 4294901760, %v5482_v34 }
 0x3a3   :  { %v5612_v29 = vpack.c.bf16 %v2994_v10, %v2987_v26  ;;  %v2360_v22 = vand.u32 4294901760, %v2359_v13  ;;  %v3007_v16 = vsub.f32 %v5479_v31, %v6042_v42  ;;  %v6048_v51 = vand.u32 4294901760, %v5484_v35 }
 0x3a4   :  { %v2367_v27 = vand.u32 4294901760, %v2366_v43  ;;  %v3001_v39 = vand.u32 4294901760, %v3000_v11  ;;  %v2373_v23 = vsub.f32 %v5482_v34, %v6043_v21  ;;  %v6050_v26 = vand.u32 4294901760, %v5488_v53 }
 0x3a5   :  { %v3008_v2 = vand.u32 4294901760, %v3007_v16  ;;  %v2380_v13 = vsub.f32 %v5484_v35, %v6048_v51  ;;  %v3014_v43 = vsub.f32 %v5486_v36, %v6049_v4 }
 0x3a6   :  { %v5624_v10 = vpack.c.bf16 %v2367_v27, %v2360_v22  ;;  %v2374_v42 = vand.u32 4294901760, %v2373_v23  ;;  %v3021_v16 = vsub.f32 %v5488_v53, %v6050_v26  ;;  %v114_v23 = vld [vmem:[#allocation2 + $0x110] ss:$8 sm:$0x3] }
 0x3a7   :  { %v5632_v11 = vpack.c.bf16 %v3008_v2, %v3001_v39  ;;  %v2381_v21 = vand.u32 4294901760, %v2380_v13  ;;  %v3015_v48 = vand.u32 4294901760, %v3014_v43 }
 0x3a8   :  { %v3022_v58 = vand.u32 4294901760, %v3021_v16 }
 0x3a9   :  { %v5637_v27 = vpack.c.bf16 %v2381_v21, %v2374_v42  ;;  %v4760_v42 = vpack.c.bf16 %v5488_v53, %v5486_v36  ;;  %v6095_v21 = vlaneseq }
 0x3aa   :  { %v5639_v22 = vpack.c.bf16 %v3022_v58, %v3015_v48 }
 0x3ab   :  { %v1623_v13 = vshrl.u32 %v6095_v21, 7 }
 0x3ad   :  { %v1624_v39 = vsub.s32 0, %v1623_v13  ;;  %v1628_v43 = vsub.s32 1, %v1623_v13 }
 0x3af   :  { %v1625_v2 = vrot.slane %v114_v23, %v1624_v39  ;;  %v1629_v4 = vrot.slane %v114_v23, %v1628_v43  ;;  %v6115_v39 = vld [vmem:[#allocation5_spill] sm:$0xff]  ;;  %v6117_v43 = vld [vmem:[#allocation6_spill] sm:$0xff] }
 0x44a   :  { %v2173_v16 = vpop.f32.mrb[6].mxu1 }
 0x44b   :  { %v4837_v51 = vadd.f32 %v2173_v16, %v1625_v2  ;;  %v2175_v41 = vpop.f32.mrb[7].mxu1  ;;  %v6114_v2 = vld [vmem:[#allocation9_spill] sm:$0xff]  ;;  %v6118_v16 = vld [vmem:[#allocation11_spill] sm:$0xff] }
 0x44c   :  { %v4838_v26 = vadd.f32 %v2175_v41, %v1629_v4 }
 0x44d   :  { %v2178_v45 = vmax.f32 %v4837_v51, 0.0 }
 0x44e   :  { %v2179_v46 = vmax.f32 %v4838_v26, 0.0 }
 0x44f   :  { %v5674_v58 = vand.u32 4294901760, %v2178_v45 }
 0x450   :  { %v5676_v30 = vand.u32 4294901760, %v2179_v46 }
 0x451   :  { %v5679_v48 = vsub.f32 %v2178_v45, %v5674_v58  ;;  %v6097_v45 = vpack.c.bf16 %v5262_v60, %v5260_v59 }
 0x452   :  { %v5682_v21 = vsub.f32 %v2179_v46, %v5676_v30  ;;  %v6098_v46 = vpack.c.bf16 %v5274_v7, %v5268_v1 }
 0x453   :  { %v2263_v13 = vand.u32 4294901760, %v5679_v48 }
 0x454   :  { %v2904_v23 = vand.u32 4294901760, %v5682_v21 }
 0x455   :  { %v2264_v41 = vsub.f32 %v5679_v48, %v2263_v13 }
 0x456   :  { %v2905_v4 = vsub.f32 %v5682_v21, %v2904_v23 }
 0x457   :  { %v2265_v51 = vand.u32 4294901760, %v2264_v41  ;;  %v6119_v41 = vld [vmem:[#allocation7_spill] sm:$0xff] }
 0x458   :  { %v2906_v26 = vand.u32 4294901760, %v2905_v4  ;;  %v6120_v4 = vld [vmem:[#allocation12_spill] sm:$0xff] }
 0x459   :  { %4003 = vmatmul.mubr.f32.vlgmr.msra.gmra.mrb[8].mxu1 %v2265_v51  ;;  %v6121_v51 = vld [vmem:[#allocation8_spill] sm:$0xff] }
 0x45a   :  { %4572 = vmatpush3.bf16.msra.mxu1 %v5491_v54  ;;  %4213 = vmatmul.mubr.f32.vlgmr.msra.gmra.mrb[4].mxu0 %v2906_v26  ;;  %v6099_v54 = vpack.c.bf16 %v5287_v18, %v5285_v15  ;;  %v6122_v26 = vld [vmem:[#allocation13_spill] sm:$0xff] }
 0x45b   :  { %4716 = vmatpush3.bf16.msra.mxu0 %v5520_v17  ;;  %4573 = vmatprep.subr.bf16.mxu1 %v6093_v32  ;;  %v6101_v17 = vpack.c.bf16 %v5311_v5, %v5309_v52 }
 0x45c   :  { %4717 = vmatprep.subr.bf16.mxu0 %v6093_v32  ;;  %4037 = vmatprep.mubr.msk.f32.mxu1 %vm4951_vm2, %v6063_v25 }
 0x45d   :  { %4247 = vmatprep.mubr.msk.f32.mxu0 %vm4951_vm2, %v6063_v25 }
 0x45e   :  { %4575 = vmatpush3.bf16.msra.mxu1 %v5531_v38  ;;  %v6102_v38 = vpack.c.bf16 %v5321_v8, %v5316_v6 }
 0x45f   :  { %4719 = vmatpush3.bf16.msra.mxu0 %v5533_v9  ;;  %4576 = vmatprep.subr.bf16.mxu1 %v6093_v32  ;;  %v6103_v9 = vpack.c.bf16 %v5335_v61, %v5333_v50 }
 0x460   :  { %4720 = vmatprep.subr.bf16.mxu0 %v6093_v32 }
 0x462   :  { %4578 = vmatpush3.bf16.msra.mxu1 %v5537_v47  ;;  %v6104_v47 = vpack.c.bf16 %v5345_v37, %v5340_v57 }
 0x463   :  { %4722 = vmatpush3.bf16.msra.mxu0 %v5561_v24  ;;  %4579 = vmatprep.subr.bf16.mxu1 %v6093_v32  ;;  %v6100_v24 = vpack.c.bf16 %v5297_v20, %v5292_v19 }
 0x464   :  { %4723 = vmatprep.subr.bf16.mxu0 %v6093_v32 }
 0x466   :  { %4581 = vmatpush3.bf16.msra.mxu1 %v5570_v0  ;;  %v6107_v0 = vpack.c.bf16 %v5470_v62, %v5468_v63 }
 0x467   :  { %4725 = vmatpush3.bf16.msra.mxu0 %v5577_v14  ;;  %4582 = vmatprep.subr.bf16.mxu1 %v6093_v32  ;;  %v6105_v14 = vpack.c.bf16 %v5461_v44, %v5459_v33 }
 0x468   :  { %4726 = vmatprep.subr.bf16.mxu0 %v6093_v32 }
 0x46a   :  { %4584 = vmatpush3.bf16.msra.mxu1 %v5584_v12  ;;  %v6108_v12 = vld [vmem:[#allocation22_spill] sm:$0xff] }
 0x46b   :  { %4728 = vmatpush3.bf16.msra.mxu0 %v5596_v40  ;;  %4585 = vmatprep.subr.bf16.mxu1 %v6093_v32  ;;  %v6106_v40 = vpack.c.bf16 %v5466_v49, %v5464_v3 }
 0x46c   :  { %4729 = vmatprep.subr.bf16.mxu0 %v6093_v32 }
 0x46e   :  { %4587 = vmatpush3.bf16.msra.mxu1 %v5604_v28  ;;  %v6096_v28 = vpack.c.bf16 %v5255_v56, %v5250_v55 }
 0x46f   :  { %4731 = vmatpush3.bf16.msra.mxu0 %v5612_v29  ;;  %4588 = vmatprep.subr.bf16.mxu1 %v6093_v32  ;;  %v6109_v29 = vld [vmem:[#allocation21_spill] sm:$0xff] }
 0x470   :  { %4732 = vmatprep.subr.bf16.mxu0 %v6093_v32 }
 0x472   :  { %4590 = vmatpush3.bf16.msra.mxu1 %v5624_v10  ;;  %v6110_v10 = vpack.c.bf16 %v6108_v12, %v6109_v29 }
 0x473   :  { %4734 = vmatpush3.bf16.msra.mxu0 %v5632_v11  ;;  %4591 = vmatprep.subr.bf16.mxu1 %v6093_v32  ;;  %v6111_v11 = vld [vmem:[#allocation23_spill] sm:$0xff] }
 0x474   :  { %4735 = vmatprep.subr.bf16.mxu0 %v6093_v32 }
 0x476   :  { %4593 = vmatpush3.bf16.msra.mxu1 %v5637_v27  ;;  %v6112_v27 = vpack.c.bf16 %v5479_v31, %v6111_v11 }
 0x477   :  { %4737 = vmatpush3.bf16.msra.mxu0 %v5639_v22  ;;  %4594 = vmatprep.subr.bf16.mxu1 %v6093_v32  ;;  %v6113_v22 = vpack.c.bf16 %v5484_v35, %v5482_v34 }
 0x478   :  { %4738 = vmatprep.subr.bf16.mxu0 %v6093_v32 }
 0x479   :  { %4038 = vmatmul.mubr.f32.vlgmr.msra.gmra.mrb[8].mxu1 %v5674_v58 }
 0x47a   :  { %4596 = vmatpush3.bf16.msra.mxu1 %v6096_v28  ;;  %4248 = vmatmul.mubr.f32.vlgmr.msra.gmra.mrb[4].mxu0 %v5676_v30  ;;  %v6123_v28 = vld [vmem:[#allocation14_spill] sm:$0xff] }
 0x47b   :  { %4740 = vmatpush3.bf16.msra.mxu0 %v6097_v45  ;;  %4597 = vmatprep.subr.bf16.mxu1 %v6093_v32  ;;  %v6124_v45 = vld [vmem:[#allocation15_spill] sm:$0xff] }
 0x47c   :  { %4741 = vmatprep.subr.bf16.mxu0 %v6093_v32  ;;  %4072 = vmatprep.mubr.msk.f32.mxu1 %vm4951_vm2, %v6063_v25 }
 0x47d   :  { %4282 = vmatprep.mubr.msk.f32.mxu0 %vm4951_vm2, %v6063_v25 }
 0x47e   :  { %4599 = vmatpush3.bf16.msra.mxu1 %v6098_v46  ;;  %v6125_v46 = vld [vmem:[#allocation16_spill] sm:$0xff] }
 0x47f   :  { %4743 = vmatpush3.bf16.msra.mxu0 %v6099_v54  ;;  %4600 = vmatprep.subr.bf16.mxu1 %v6093_v32  ;;  %v6126_v54 = vld [vmem:[#allocation17_spill] sm:$0xff] }
 0x480   :  { %4744 = vmatprep.subr.bf16.mxu0 %v6093_v32 }
 0x482   :  { %4602 = vmatpush3.bf16.msra.mxu1 %v6100_v24  ;;  %v6127_v24 = vld [vmem:[#allocation18_spill] sm:$0xff] }
 0x483   :  { %4746 = vmatpush3.bf16.msra.mxu0 %v6101_v17  ;;  %4603 = vmatprep.subr.bf16.mxu1 %v6093_v32  ;;  %v6128_v17 = vld [vmem:[#allocation19_spill] sm:$0xff] }
 0x484   :  { %4747 = vmatprep.subr.bf16.mxu0 %v6093_v32 }
 0x486   :  { %4605 = vmatpush3.bf16.msra.mxu1 %v6102_v38  ;;  %v6129_v38 = vand.u32 4294901760, %v5250_v55  ;;  %v6134_v55 = vand.u32 4294901760, %v5268_v1  ;;  %v6138_v1 = vand.u32 4294901760, %v5292_v19  ;;  %v6144_v19 = vand.u32 4294901760, %v5333_v50 }
 0x487   :  { %4749 = vmatpush3.bf16.msra.mxu0 %v6103_v9  ;;  %4606 = vmatprep.subr.bf16.mxu1 %v6093_v32  ;;  %v6130_v9 = vand.u32 4294901760, %v5255_v56  ;;  %v6135_v56 = vand.u32 4294901760, %v5274_v7  ;;  %v6139_v7 = vand.u32 4294901760, %v5297_v20  ;;  %v6145_v20 = vand.u32 4294901760, %v5335_v61 }
 0x488   :  { %4750 = vmatprep.subr.bf16.mxu0 %v6093_v32  ;;  %v6150_v61 = vand.u32 4294901760, %v5464_v3  ;;  %v6151_v50 = vand.u32 4294901760, %v5466_v49  ;;  %v6156_v3 = vand.u32 4294901760, %v6111_v11  ;;  %v6157_v49 = vand.u32 4294901760, %v5479_v31  ;;  %v148_v31 = vld [vmem:[#allocation2 + $0x228] ss:$0 sm:$0xff] }
 0x48a   :  { %4608 = vmatpush3.bf16.msra.mxu1 %v6104_v47  ;;  %v4643_v47 = vpack.c.bf16 %v6130_v9, %v6129_v38  ;;  %v4796_v9 = vpack.c.bf16 %v6145_v20, %v6144_v19 }
 0x48b   :  { %4752 = vmatpush3.bf16.msra.mxu0 %v6105_v14  ;;  %4609 = vmatprep.subr.bf16.mxu1 %v6093_v32  ;;  %v6131_v14 = vld [vmem:[#allocation20_spill] sm:$0xff] }
 0x48c   :  { %4753 = vmatprep.subr.bf16.mxu0 %v6093_v32 }
 0x48e   :  { %4611 = vmatpush3.bf16.msra.mxu1 %v6106_v40  ;;  %v6132_v40 = vand.u32 4294901760, %v5260_v59  ;;  %v6136_v59 = vand.u32 4294901760, %v5285_v15  ;;  %v6140_v15 = vand.u32 4294901760, %v5309_v52  ;;  %v6146_v52 = vand.u32 4294901760, %v5340_v57 }
 0x48f   :  { %4755 = vmatpush3.bf16.msra.mxu0 %v6107_v0  ;;  %4612 = vmatprep.subr.bf16.mxu1 %v6093_v32  ;;  %v6133_v0 = vand.u32 4294901760, %v5262_v60  ;;  %v6137_v60 = vand.u32 4294901760, %v5287_v18  ;;  %v6141_v18 = vand.u32 4294901760, %v5311_v5  ;;  %v6147_v5 = vand.u32 4294901760, %v5345_v37 }
 0x490   :  { %4756 = vmatprep.subr.bf16.mxu0 %v6093_v32  ;;  %v6152_v37 = vand.u32 4294901760, %v5468_v63  ;;  %v6153_v57 = vand.u32 4294901760, %v5470_v62  ;;  %v6158_v63 = vand.u32 4294901760, %v5482_v34  ;;  %v6159_v62 = vand.u32 4294901760, %v5484_v35 }
 0x492   :  { %4614 = vmatpush3.bf16.msra.mxu1 %v6110_v10  ;;  %v4787_v10 = vpack.c.bf16 %v6133_v0, %v6132_v40  ;;  %v4658_v0 = vpack.c.bf16 %v6151_v50, %v6150_v61 }
 0x493   :  { %4758 = vmatpush3.bf16.msra.mxu0 %v6112_v27  ;;  %4615 = vmatprep.subr.bf16.mxu1 %v6093_v32  ;;  %v4646_v27 = vpack.c.bf16 %v6135_v56, %v6134_v55  ;;  %v4805_v56 = vpack.c.bf16 %v6157_v49, %v6156_v3 }
 0x494   :  { %4759 = vmatprep.subr.bf16.mxu0 %v6093_v32 }
 0x496   :  { %4617 = vmatpush3.bf16.msra.mxu1 %v6113_v22  ;;  %v4790_v22 = vpack.c.bf16 %v6137_v60, %v6136_v59 }
 0x497   :  { %4761 = vmatpush3.bf16.msra.mxu0 %v4760_v42  ;;  %4618 = vmatprep.subr.bf16.mxu1 %v6093_v32  ;;  %v6116_v42 = vld [vmem:[#allocation10_spill] sm:$0xff] }
 0x498   :  { %4762 = vmatprep.subr.bf16.mxu0 %v6093_v32 }
 0x499   :  { %4073 = vmatmul.mubr.f32.vlgmr.msra.gmra.mrb[8].mxu1 %v5679_v48  ;;  %v4649_v48 = vpack.c.bf16 %v6139_v7, %v6138_v1 }
 0x49a   :  { %4620 = vmatpush3.bf16.msra.mxu1 %v6114_v2  ;;  %4283 = vmatmul.mubr.f32.vlgmr.msra.gmra.mrb[4].mxu0 %v5682_v21  ;;  %v4793_v21 = vpack.c.bf16 %v6141_v18, %v6140_v15 }
 0x49b   :  { %4764 = vmatpush3.bf16.msra.mxu0 %v6115_v39  ;;  %4621 = vmatprep.subr.bf16.mxu1 %v6093_v32 }
 0x49c   :  { %4765 = vmatprep.subr.bf16.mxu0 %v6093_v32  ;;  %4107 = vmatprep.mubr.msk.f32.mxu1 %vm4951_vm2, %v6063_v25 }
 0x49d   :  { %4317 = vmatprep.mubr.msk.f32.mxu0 %vm4951_vm2, %v6063_v25 }
 0x49e   :  { %4623 = vmatpush3.bf16.msra.mxu1 %v6116_v42 }
 0x49f   :  { %4767 = vmatpush3.bf16.msra.mxu0 %v6117_v43  ;;  %4624 = vmatprep.subr.bf16.mxu1 %v6093_v32 }
 0x4a0   :  { %4768 = vmatprep.subr.bf16.mxu0 %v6093_v32 }
 0x4a2   :  { %4626 = vmatpush3.bf16.msra.mxu1 %v6118_v16 }
 0x4a3   :  { %4770 = vmatpush3.bf16.msra.mxu0 %v6119_v41  ;;  %4627 = vmatprep.subr.bf16.mxu1 %v6093_v32 }
 0x4a4   :  { %4771 = vmatprep.subr.bf16.mxu0 %v6093_v32 }
 0x4a6   :  { %4629 = vmatpush3.bf16.msra.mxu1 %v6120_v4 }
 0x4a7   :  { %4773 = vmatpush3.bf16.msra.mxu0 %v6121_v51  ;;  %4630 = vmatprep.subr.bf16.mxu1 %v6093_v32 }
 0x4a8   :  { %4774 = vmatprep.subr.bf16.mxu0 %v6093_v32 }
 0x4aa   :  { %4632 = vmatpush3.bf16.msra.mxu1 %v6122_v26 }
 0x4ab   :  { %4776 = vmatpush3.bf16.msra.mxu0 %v6123_v28  ;;  %4633 = vmatprep.subr.bf16.mxu1 %v6093_v32 }
 0x4ac   :  { %4777 = vmatprep.subr.bf16.mxu0 %v6093_v32 }
 0x4ae   :  { %4635 = vmatpush3.bf16.msra.mxu1 %v6124_v45 }
 0x4af   :  { %4779 = vmatpush3.bf16.msra.mxu0 %v6125_v46  ;;  %4636 = vmatprep.subr.bf16.mxu1 %v6093_v32 }
 0x4b0   :  { %4780 = vmatprep.subr.bf16.mxu0 %v6093_v32 }
 0x4b2   :  { %4638 = vmatpush3.bf16.msra.mxu1 %v6126_v54 }
 0x4b3   :  { %4782 = vmatpush3.bf16.msra.mxu0 %v6127_v24  ;;  %4639 = vmatprep.subr.bf16.mxu1 %v6093_v32 }
 0x4b4   :  { %4783 = vmatprep.subr.bf16.mxu0 %v6093_v32 }
 0x4b6   :  { %4641 = vmatpush3.bf16.msra.mxu1 %v6128_v17 }
 0x4b7   :  { %4785 = vmatpush3.bf16.msra.mxu0 %v6131_v14  ;;  %4642 = vmatprep.subr.bf16.mxu1 %v6093_v32 }
 0x4b8   :  { %4786 = vmatprep.subr.bf16.mxu0 %v6093_v32 }
 0x4b9   :  { %4108 = vmatmul.mubr.f32.vlgmr.msra.gmra.mrb[8].mxu1 %v2263_v13  ;;  %v6142_v13 = vand.u32 4294901760, %v5316_v6  ;;  %v6148_v6 = vand.u32 4294901760, %v5459_v33  ;;  %v6155_v33 = vand.u32 4294901760, %v6108_v12  ;;  %v6160_v12 = vand.u32 4294901760, %v5486_v36 }
 0x4ba   :  { %4644 = vmatpush3.bf16.msra.mxu1 %v4643_v47  ;;  %4318 = vmatmul.mubr.f32.vlgmr.msra.gmra.mrb[4].mxu0 %v2904_v23  ;;  %v6143_v23 = vand.u32 4294901760, %v5321_v8  ;;  %v4655_v47 = vpack.c.bf16 %v6147_v5, %v6146_v52  ;;  %v6149_v8 = vand.u32 4294901760, %v5461_v44  ;;  %v6154_v44 = vand.u32 4294901760, %v6109_v29 }
 0x4bb   :  { %4788 = vmatpush3.bf16.msra.mxu0 %v4787_v10  ;;  %4645 = vmatprep.subr.bf16.mxu1 %v6093_v32  ;;  %v4802_v10 = vpack.c.bf16 %v6153_v57, %v6152_v37  ;;  %v6161_v29 = vand.u32 4294901760, %v5488_v53 }
 0x4bc   :  { %4789 = vmatprep.subr.bf16.mxu0 %v6093_v32  ;;  %4142 = vmatprep.mubr.msk.f32.mxu1 %vm4951_vm2, %v6063_v25  ;;  %v4652_v38 = vpack.c.bf16 %v6143_v23, %v6142_v13  ;;  %v4799_v40 = vpack.c.bf16 %v6149_v8, %v6148_v6  ;;  %v4661_v55 = vpack.c.bf16 %v6155_v33, %v6154_v44 }
 0x4bd   :  { %4352 = vmatprep.mubr.msk.f32.mxu0 %vm4951_vm2, %v6063_v25  ;;  %v4808_v59 = vpack.c.bf16 %v6161_v29, %v6160_v12 }
 0x4be   :  { %4647 = vmatpush3.bf16.msra.mxu1 %v4646_v27  ;;  %v4664_v27 = vpack.c.bf16 %v6159_v62, %v6158_v63 }
 0x4bf   :  { %4791 = vmatpush3.bf16.msra.mxu0 %v4790_v22  ;;  %4648 = vmatprep.subr.bf16.mxu1 %v6093_v32 }
 0x4c0   :  { %4792 = vmatprep.subr.bf16.mxu0 %v6093_v32 }
 0x4c2   :  { %4650 = vmatpush3.bf16.msra.mxu1 %v4649_v48 }
 0x4c3   :  { %4794 = vmatpush3.bf16.msra.mxu0 %v4793_v21  ;;  %4651 = vmatprep.subr.bf16.mxu1 %v6093_v32 }
 0x4c4   :  { %4795 = vmatprep.subr.bf16.mxu0 %v6093_v32 }
 0x4c6   :  { %4653 = vmatpush3.bf16.msra.mxu1 %v4652_v38 }
 0x4c7   :  { %4797 = vmatpush3.bf16.msra.mxu0 %v4796_v9  ;;  %4654 = vmatprep.subr.bf16.mxu1 %v6093_v32 }
 0x4c8   :  { %4798 = vmatprep.subr.bf16.mxu0 %v6093_v32 }
 0x4ca   :  { %4656 = vmatpush3.bf16.msra.mxu1 %v4655_v47 }
 0x4cb   :  { %4800 = vmatpush3.bf16.msra.mxu0 %v4799_v40  ;;  %4657 = vmatprep.subr.bf16.mxu1 %v6093_v32 }
 0x4cc   :  { %4801 = vmatprep.subr.bf16.mxu0 %v6093_v32 }
 0x4ce   :  { %4659 = vmatpush3.bf16.msra.mxu1 %v4658_v0 }
 0x4cf   :  { %4803 = vmatpush3.bf16.msra.mxu0 %v4802_v10  ;;  %4660 = vmatprep.subr.bf16.mxu1 %v6093_v32 }
 0x4d0   :  { %4804 = vmatprep.subr.bf16.mxu0 %v6093_v32 }
 0x4d2   :  { %4662 = vmatpush3.bf16.msra.mxu1 %v4661_v55 }
 0x4d3   :  { %4806 = vmatpush3.bf16.msra.mxu0 %v4805_v56  ;;  %4663 = vmatprep.subr.bf16.mxu1 %v6093_v32 }
 0x4d4   :  { %4807 = vmatprep.subr.bf16.mxu0 %v6093_v32 }
 0x4d6   :  { %4665 = vmatpush3.bf16.msra.mxu1 %v4664_v27 }
 0x4d7   :  { %4809 = vmatpush3.bf16.msra.mxu0 %v4808_v59  ;;  %4666 = vmatprep.subr.bf16.mxu1 %v6093_v32 }
 0x4d8   :  { %4810 = vmatprep.subr.bf16.mxu0 %v6093_v32 }
 0x4d9   :  { %4143 = vmatmul.mubr.f32.vlgmr.msra.gmra.mrb[8].mxu1 %v5674_v58 }
 0x4da   :  { %4668 = vmatpush3.bf16.msra.mxu1 %v6114_v2  ;;  %4353 = vmatmul.mubr.f32.vlgmr.msra.gmra.mrb[4].mxu0 %v5676_v30 }
 0x4db   :  { %4812 = vmatpush3.bf16.msra.mxu0 %v6115_v39  ;;  %4669 = vmatprep.subr.bf16.mxu1 %v6093_v32 }
 0x4dc   :  { %4813 = vmatprep.subr.bf16.mxu0 %v6093_v32  ;;  %4177 = vmatprep.mubr.msk.f32.mxu1 %vm4951_vm2, %v6063_v25 }
 0x4dd   :  { %4387 = vmatprep.mubr.msk.f32.mxu0 %vm4951_vm2, %v6063_v25  ;;  %v147_v25 = vld [vmem:[#allocation2 + $0x220] ss:$0 sm:$0xff] }
 0x4de   :  { %4671 = vmatpush3.bf16.msra.mxu1 %v6116_v42 }
 0x4df   :  { %4815 = vmatpush3.bf16.msra.mxu0 %v6117_v43  ;;  %4672 = vmatprep.subr.bf16.mxu1 %v6093_v32 }
 0x4e0   :  { %4816 = vmatprep.subr.bf16.mxu0 %v6093_v32 }
 0x4e2   :  { %4674 = vmatpush3.bf16.msra.mxu1 %v6118_v16 }
 0x4e3   :  { %4818 = vmatpush3.bf16.msra.mxu0 %v6119_v41  ;;  %4675 = vmatprep.subr.bf16.mxu1 %v6093_v32 }
 0x4e4   :  { %4819 = vmatprep.subr.bf16.mxu0 %v6093_v32 }
 0x4e6   :  { %4677 = vmatpush3.bf16.msra.mxu1 %v6120_v4 }
 0x4e7   :  { %4821 = vmatpush3.bf16.msra.mxu0 %v6121_v51  ;;  %4678 = vmatprep.subr.bf16.mxu1 %v6093_v32 }
 0x4e8   :  { %4822 = vmatprep.subr.bf16.mxu0 %v6093_v32 }
 0x4ea   :  { %4680 = vmatpush3.bf16.msra.mxu1 %v6122_v26 }
 0x4eb   :  { %4824 = vmatpush3.bf16.msra.mxu0 %v6123_v28  ;;  %4681 = vmatprep.subr.bf16.mxu1 %v6093_v32 }
 0x4ec   :  { %4825 = vmatprep.subr.bf16.mxu0 %v6093_v32 }
 0x4ee   :  { %4683 = vmatpush3.bf16.msra.mxu1 %v6124_v45 }
 0x4ef   :  { %4827 = vmatpush3.bf16.msra.mxu0 %v6125_v46  ;;  %4684 = vmatprep.subr.bf16.mxu1 %v6093_v32 }
 0x4f0   :  { %4828 = vmatprep.subr.bf16.mxu0 %v6093_v32 }
 0x4f2   :  { %4686 = vmatpush3.bf16.msra.mxu1 %v6126_v54 }
 0x4f3   :  { %4830 = vmatpush3.bf16.msra.mxu0 %v6127_v24  ;;  %4687 = vmatprep.subr.bf16.mxu1 %v6093_v32 }
 0x4f4   :  { %4831 = vmatprep.subr.bf16.mxu0 %v6093_v32 }
 0x4f6   :  { %4689 = vmatpush3.bf16.msra.mxu1 %v6128_v17 }
 0x4f7   :  { %4833 = vmatpush3.bf16.msra.mxu0 %v6131_v14 }
 0x4f9   :  { %4178 = vmatmul.mubr.f32.vlgmr.msra.gmra.mrb[8].mxu1 %v5674_v58 }
 0x4fa   :  { %4388 = vmatmul.mubr.f32.vlgmr.msra.gmra.mrb[4].mxu0 %v5676_v30 }
 0x5cc   :  { %v2817_v34 = vpop.f32.mrb[8].mxu1 }
 0x5cd   :  { %v4839_v35 = vadd.f32 %v2817_v34, %v147_v25  ;;  %v4179_v36 = vpop.f32.mrb[9].mxu1  ;;  %v3458_v53 = vpop.f32.mrb[4].mxu0 }
 0x5ce   :  { %v4840_v11 = vadd.f32 %v3458_v53, %v148_v31  ;;  %v4389_v2 = vpop.f32.mrb[5].mxu0 }
 0x5cf   :  { %3463 = vst [vmem:[%s5974_s3 + $0x8] sm:$0xff] %v4839_v35 }
 0x5d0   :  { %3462 = vst [vmem:[%s5974_s3] sm:$0xff] %v4840_v11  ;;  %3464 = vst [vmem:[%s5974_s3 + $0x10] sm:$0xff] %v4840_v11 }
 0x5d1   :  { %3469 = vsyncpa [#allocation3], 1 }

</bundles_post_ra>
